<compile_context>
chip_gen: v7x
topology: tpu7x:2x2x1
jax: 0.10.0
libtpu: 0.0.40
codegen_flags: <defaults>
</compile_context>

<pallas_src>
import functools

import jax
import jax.numpy as jnp
import numpy as np
from jax import lax
from jax.experimental import pallas as pl
from jax.experimental.pallas import tpu as pltpu


def _round_up(x, m):
    return ((x + m - 1) // m) * m


# ----------------------------------------------------------------------------
# Fused Pallas kernel: one time chunk of all LSTM layers + linear head
# ----------------------------------------------------------------------------
def _fused_lstm_kernel(*refs, n_layers, TC, BP, HP):
    """Refs (in order):
      inputs : x_ref (TC*BP, I0),
               per layer l: wih_ref (Kin_l, 4*HP), whh_ref (HP, 4*HP), b_ref (1, 4*HP),
               who_ref (HP, OP), bho_ref (1, OP)
      outputs: out_ref (TC*BP, OP)
      scratch: gx_sc (TC*BP, 4*HP)   -- hoisted per-layer input projection
               y_sc  (TC*BP, HP)     -- per-layer hidden outputs (next layer input)
               h_st  (n_layers, BP, HP), c_st (n_layers, BP, HP)  -- recurrent state
    """
    x_ref = refs[0]
    layer_refs = refs[1:1 + 3 * n_layers]
    who_ref, bho_ref, out_ref, gx_sc, y_sc, h_st, c_st = refs[1 + 3 * n_layers:]

    # init_hidden: zero the recurrent state on the first time chunk only.
    @pl.when(pl.program_id(0) == 0)
    def _():
        h_st[...] = jnp.zeros_like(h_st)
        c_st[...] = jnp.zeros_like(c_st)

    cur2d = x_ref[...]                     # (TC*BP, I0), current layer input

    for l in range(n_layers):
        wih_ref, whh_ref, b_ref = layer_refs[3 * l: 3 * l + 3]

        # Hoisted input projection + folded bias: one batched MXU matmul over
        # the whole chunk; keeps only h @ W_hh on the serial chain.
        gx_sc[...] = (
            jnp.dot(cur2d, wih_ref[...], preferred_element_type=jnp.float32)
            + b_ref[...]
        )

        def time_step(t, carry, whh_ref=whh_ref):
            h, c = carry
            row = pl.ds(pl.multiple_of(t * BP, BP), BP)   # aligned (8,128) tiles
            # Re-read W_hh from VMEM each step instead of pinning 64 vregs live
            # across the unrolled loop (spare vld slots cover it).
            gates = gx_sc[row, :] + jnp.dot(
                h, whh_ref[...], preferred_element_type=jnp.float32)  # (BP, 4*HP)
            # Packed gate order [i|f|o|g]: one wide sigmoid + one tanh per step.
            sig = jax.nn.sigmoid(gates[:, :3 * HP])
            g_g = jnp.tanh(gates[:, 3 * HP:])
            i_g = sig[:, 0 * HP:1 * HP]
            f_g = sig[:, 1 * HP:2 * HP]
            o_g = sig[:, 2 * HP:3 * HP]
            c = f_g * c + i_g * g_g
            h = o_g * jnp.tanh(c)
            y_sc[row, :] = h
            return h, c

        carry = (h_st[l], c_st[l])
        carry = lax.fori_loop(0, TC, time_step, carry, unroll=True)
        h_st[l] = carry[0]
        c_st[l] = carry[1]

        cur2d = y_sc[...]                  # next layer's input (TC*BP, HP)

    # h2o linear head fused in; lane-dense (TC*BP, OP) store.
    out_ref[...] = (
        jnp.dot(cur2d, who_ref[...], preferred_element_type=jnp.float32)
        + bho_ref[...]
    )


# ----------------------------------------------------------------------------
# One-time parameter prep: gate reorder [i|f|o|g], lane padding, bias folding
# ----------------------------------------------------------------------------
def prepare_params(params):
    n_layers = len(params["lstm"])
    H = params["lstm"][0]["w_hh_t"].shape[0]
    O = params["h2o_w_t"].shape[1]
    HP = _round_up(H, 128)
    OP = _round_up(O, 128)
    order = np.array([0, 1, 3, 2])  # i, f, o, g  (sigmoid gates contiguous)

    def pack_cols(w_t, rows_to=None):
        k = w_t.shape[0]
        w4 = w_t.reshape(k, 4, H)[:, order, :]
        w4 = jnp.pad(w4, ((0, 0), (0, 0), (0, HP - H)))
        w2 = w4.reshape(k, 4 * HP)
        if rows_to is not None and rows_to != k:
            w2 = jnp.pad(w2, ((0, rows_to - k), (0, 0)))
        return w2

    layers = []
    for l, layer in enumerate(params["lstm"]):
        w_ih_p = pack_cols(layer["w_ih_t"], rows_to=None if l == 0 else HP)
        w_hh_p = pack_cols(layer["w_hh_t"], rows_to=HP)
        b4 = layer["bias"].reshape(4, H)[order, :]
        b_p = jnp.pad(b4, ((0, 0), (0, HP - H))).reshape(1, 4 * HP)
        layers.append((w_ih_p, w_hh_p, b_p))

    who_p = jnp.pad(params["h2o_w_t"], ((0, HP - H), (0, OP - O)))  # (HP, OP)
    bho_p = jnp.pad(params["h2o_b"], (0, OP - O)).reshape(1, OP)    # (1, OP)
    return {"layers": layers, "who": who_p, "bho": bho_p}


# ----------------------------------------------------------------------------
# Forward wrapper: time-chunked grid, streamed x/out, persistent state scratch
# ----------------------------------------------------------------------------
def our_lstm_forward(batch, prep, num_outputs, *, time_chunk=16):
    """batch: (T, B, num_inputs). Returns (output (T, B, num_outputs), seq_lens (B,))."""
    T, B, I = batch.shape
    layers = prep["layers"]
    n_layers = len(layers)
    HP = layers[0][1].shape[0]
    OP = prep["who"].shape[1]

    BP = _round_up(B, 8)                    # sublane-padded batch
    TC = min(time_chunk, T)                 # timesteps per grid step
    Tpad = _round_up(T, TC)
    num_chunks = Tpad // TC

    xb = batch
    if Tpad > T or BP > B:
        xb = jnp.pad(batch, ((0, Tpad - T), (0, BP - B), (0, 0)))
    x2d = xb.reshape(Tpad * BP, I)          # row (t, b) -> t*BP + b

    flat_inputs = [x2d]
    in_specs = [pl.BlockSpec((TC * BP, I), lambda c: (c, 0))]
    for (w_ih_p, w_hh_p, b_p) in layers:
        flat_inputs += [w_ih_p, w_hh_p, b_p]
        in_specs += [
            pl.BlockSpec(w_ih_p.shape, lambda c: (0, 0)),
            pl.BlockSpec(w_hh_p.shape, lambda c: (0, 0)),
            pl.BlockSpec(b_p.shape, lambda c: (0, 0)),
        ]
    flat_inputs += [prep["who"], prep["bho"]]
    in_specs += [pl.BlockSpec(prep["who"].shape, lambda c: (0, 0)),
                 pl.BlockSpec(prep["bho"].shape, lambda c: (0, 0))]

    scratch_shapes = [
        pltpu.VMEM((TC * BP, 4 * HP), jnp.float32),    # hoisted input projection
        pltpu.VMEM((TC * BP, HP), jnp.float32),        # per-layer hidden outputs
        pltpu.VMEM((n_layers, BP, HP), jnp.float32),   # h state (persists across chunks)
        pltpu.VMEM((n_layers, BP, HP), jnp.float32),   # c state (persists across chunks)
    ]

    # VMEM budget: weights (double-buffered worst case) + streamed chunks + scratch.
    f32 = 4
    weight_bytes = sum(int(np.prod(a.shape)) for lyr in layers for a in lyr) * f32
    weight_bytes += (int(np.prod(prep["who"].shape)) +
                     int(np.prod(prep["bho"].shape))) * f32
    stream_bytes = 2 * TC * BP * (I + OP) * f32
    scratch_bytes = (TC * BP * 5 * HP + 2 * n_layers * BP * HP) * f32
    vmem_limit = 2 * weight_bytes + stream_bytes + scratch_bytes + (8 << 20)
    vmem_limit = int(min(64 << 20, max(16 << 20, vmem_limit)))

    kernel = functools.partial(_fused_lstm_kernel,
                               n_layers=n_layers, TC=TC, BP=BP, HP=HP)

    out2d = pl.pallas_call(
        kernel,
        out_shape=jax.ShapeDtypeStruct((Tpad * BP, OP), jnp.float32),
        grid=(num_chunks,),
        in_specs=in_specs,
        out_specs=pl.BlockSpec((TC * BP, OP), lambda c: (c, 0)),
        scratch_shapes=scratch_shapes,
        compiler_params=pltpu.CompilerParams(
            dimension_semantics=("arbitrary",),
            vmem_limit_bytes=vmem_limit),
    )(*flat_inputs)

    output = out2d.reshape(Tpad, BP, OP)[:T, :B, :num_outputs]
    seq_lens = jnp.full((B,), T, dtype=jnp.int32)
    return output, seq_lens


# ----------------------------------------------------------------------------
# Deterministic parameter init (matches nn.LSTM / nn.Linear shapes)
# ----------------------------------------------------------------------------
def init_params(key, num_inputs, num_outputs, hidden_size, n_layers):
    params = {"lstm": []}
    k_lstm = 1.0 / np.sqrt(hidden_size)
    for l in range(n_layers):
        in_sz = num_inputs if l == 0 else hidden_size
        key, k1, k2, k3, k4 = jax.random.split(key, 5)
        w_ih = jax.random.uniform(k1, (4 * hidden_size, in_sz),
                                  minval=-k_lstm, maxval=k_lstm, dtype=jnp.float32)
        w_hh = jax.random.uniform(k2, (4 * hidden_size, hidden_size),
                                  minval=-k_lstm, maxval=k_lstm, dtype=jnp.float32)
        b_ih = jax.random.uniform(k3, (4 * hidden_size,),
                                  minval=-k_lstm, maxval=k_lstm, dtype=jnp.float32)
        b_hh = jax.random.uniform(k4, (4 * hidden_size,),
                                  minval=-k_lstm, maxval=k_lstm, dtype=jnp.float32)
        params["lstm"].append({
            "w_ih_t": w_ih.T,          # (in_sz, 4H), gate order [i|f|g|o]
            "w_hh_t": w_hh.T,          # (H, 4H)
            "bias": b_ih + b_hh,       # (4H,)
        })
    k_lin = 1.0 / np.sqrt(hidden_size)
    key, k1, k2 = jax.random.split(key, 3)
    h2o_w = jax.random.uniform(k1, (num_outputs, hidden_size),
                               minval=-k_lin, maxval=k_lin, dtype=jnp.float32)
    h2o_b = jax.random.uniform(k2, (num_outputs,),
                               minval=-k_lin, maxval=k_lin, dtype=jnp.float32)
    params["h2o_w_t"] = h2o_w.T        # (H, O)
    params["h2o_b"] = h2o_b
    return params


# Pure-JAX reference (lax.scan, original [i|f|g|o] gate order) for correctness.
def reference_forward(batch, params):
    x = batch
    for layer in params["lstm"]:
        w_ih_t, w_hh_t, bias = layer["w_ih_t"], layer["w_hh_t"], layer["bias"]
        H = w_hh_t.shape[0]
        B = x.shape[1]

        def step(carry, x_t):
            h, c = carry
            gates = x_t @ w_ih_t + h @ w_hh_t + bias
            i = jax.nn.sigmoid(gates[:, 0 * H:1 * H])
            f = jax.nn.sigmoid(gates[:, 1 * H:2 * H])
            g = jnp.tanh(gates[:, 2 * H:3 * H])
            o = jax.nn.sigmoid(gates[:, 3 * H:4 * H])
            c = f * c + i * g
            h = o * jnp.tanh(c)
            return (h, c), h

        h0 = jnp.zeros((B, H), jnp.float32)
        (_, _), x = jax.lax.scan(step, (h0, h0), x)
    out = x @ params["h2o_w_t"] + params["h2o_b"]
    return out


if __name__ == "__main__":
    T, B = 8, 2                      # seq len, batch
    NUM_INPUTS, NUM_OUTPUTS = 4, 3
    HIDDEN, N_LAYERS = 32, 2

    key = jax.random.PRNGKey(0)
    key, pkey, xkey = jax.random.split(key, 3)
    params = init_params(pkey, NUM_INPUTS, NUM_OUTPUTS, HIDDEN, N_LAYERS)
    batch = jax.random.normal(xkey, (T, B, NUM_INPUTS), dtype=jnp.float32)

    # One-time parameter prep (padding / gate reorder) outside the jitted forward.
    prep = prepare_params(params)

    # time_chunk=4 exercises the multi-chunk grid path (state carried across chunks).
    fwd = jax.jit(functools.partial(our_lstm_forward,
                                    num_outputs=NUM_OUTPUTS, time_chunk=4))
    output, seq_lens = fwd(batch, prep)
    output = jax.block_until_ready(output)
    seq_lens = jax.block_until_ready(seq_lens)

    ref = reference_forward(batch, params)
    assert output.shape == (T, B, NUM_OUTPUTS)
    assert seq_lens.shape == (B,) and int(seq_lens[0]) == T
    np.testing.assert_allclose(np.asarray(output), np.asarray(ref),
                               rtol=1e-4, atol=1e-4)

    print("KERNEL_OK")
</pallas_src>

<mosaic_0001>
module attributes {stable_mosaic.version = 11 : i64} {
  func.func @_fused_lstm_kernel(%arg0: i32, %arg1: memref<32x4xf32, #tpu.memory_space<vmem>>, %arg2: memref<4x512xf32, #tpu.memory_space<vmem>>, %arg3: memref<128x512xf32, #tpu.memory_space<vmem>>, %arg4: memref<1x512xf32, #tpu.memory_space<vmem>>, %arg5: memref<128x512xf32, #tpu.memory_space<vmem>>, %arg6: memref<128x512xf32, #tpu.memory_space<vmem>>, %arg7: memref<1x512xf32, #tpu.memory_space<vmem>>, %arg8: memref<128x128xf32, #tpu.memory_space<vmem>>, %arg9: memref<1x128xf32, #tpu.memory_space<vmem>>, %arg10: memref<32x128xf32, #tpu.memory_space<vmem>>, %arg11: memref<32x512xf32, #tpu.memory_space<vmem>>, %arg12: memref<32x128xf32, #tpu.memory_space<vmem>>, %arg13: memref<2x8x128xf32, #tpu.memory_space<vmem>>, %arg14: memref<2x8x128xf32, #tpu.memory_space<vmem>>) attributes {dimension_semantics = [#tpu.dimension_semantics<arbitrary>], iteration_bounds = array<i64: 2>, scalar_prefetch = 0 : i64, scratch_operands = 4 : i64, tpu.core_type = #tpu.core_type<tc>, window_params = [{transform_indices = @transform_0, window_bounds = array<i64: 32, 4>}, {pipeline_mode = #tpu.pipeline_mode<synchronous>, transform_indices = @transform_1, window_bounds = array<i64: 4, 512>}, {pipeline_mode = #tpu.pipeline_mode<synchronous>, transform_indices = @transform_2, window_bounds = array<i64: 128, 512>}, {pipeline_mode = #tpu.pipeline_mode<synchronous>, transform_indices = @transform_3, window_bounds = array<i64: 1, 512>}, {pipeline_mode = #tpu.pipeline_mode<synchronous>, transform_indices = @transform_4, window_bounds = array<i64: 128, 512>}, {pipeline_mode = #tpu.pipeline_mode<synchronous>, transform_indices = @transform_5, window_bounds = array<i64: 128, 512>}, {pipeline_mode = #tpu.pipeline_mode<synchronous>, transform_indices = @transform_6, window_bounds = array<i64: 1, 512>}, {pipeline_mode = #tpu.pipeline_mode<synchronous>, transform_indices = @transform_7, window_bounds = array<i64: 128, 128>}, {pipeline_mode = #tpu.pipeline_mode<synchronous>, transform_indices = @transform_8, window_bounds = array<i64: 1, 128>}, {transform_indices = @transform_9, window_bounds = array<i64: 32, 128>}]} {
    %c0_i32 = arith.constant 0 : i32
    %0 = arith.cmpi eq, %arg0, %c0_i32 : i32
    %1 = arith.extui %0 : i1 to i32
    %c0_i32_0 = arith.constant 0 : i32
    %2 = arith.cmpi ne, %1, %c0_i32_0 : i32
    scf.if %2 {
      %cst_110 = arith.constant 0.000000e+00 : f32
      %244 = vector.broadcast %cst_110 : f32 to vector<2x8x128xf32>
      %c0_111 = arith.constant 0 : index
      %c0_112 = arith.constant 0 : index
      %c0_113 = arith.constant 0 : index
      %245 = vector.load %arg13[%c0_111, %c0_112, %c0_113] : memref<2x8x128xf32, #tpu.memory_space<vmem>>, vector<2x8x128xf32>
      tpu.vector_store %arg13[%c0_111, %c0_112, %c0_113], %244 {strides = array<i32>} : memref<2x8x128xf32, #tpu.memory_space<vmem>>, vector<2x8x128xf32>,
      %cst_114 = arith.constant 0.000000e+00 : f32
      %246 = vector.broadcast %cst_114 : f32 to vector<2x8x128xf32>
      %c0_115 = arith.constant 0 : index
      %c0_116 = arith.constant 0 : index
      %c0_117 = arith.constant 0 : index
      %247 = vector.load %arg14[%c0_115, %c0_116, %c0_117] : memref<2x8x128xf32, #tpu.memory_space<vmem>>, vector<2x8x128xf32>
      tpu.vector_store %arg14[%c0_115, %c0_116, %c0_117], %246 {strides = array<i32>} : memref<2x8x128xf32, #tpu.memory_space<vmem>>, vector<2x8x128xf32>,
    } else {
    }
    %c0 = arith.constant 0 : index
    %c0_1 = arith.constant 0 : index
    %3 = vector.load %arg1[%c0, %c0_1] : memref<32x4xf32, #tpu.memory_space<vmem>>, vector<32x4xf32>
    %c0_2 = arith.constant 0 : index
    %c0_3 = arith.constant 0 : index
    %4 = vector.load %arg2[%c0_2, %c0_3] : memref<4x512xf32, #tpu.memory_space<vmem>>, vector<4x512xf32>
    %cst = arith.constant dense<0.000000e+00> : vector<32x512xf32>
    %5 = tpu.matmul %3, %4, %cst {dimension_numbers = #tpu.dot_dimension_numbers<[1], [0], [0], [1], [0, 0, 1, 1], [], []>} : vector<32x4xf32>, vector<4x512xf32>, vector<32x512xf32> -> vector<32x512xf32>
    %c0_4 = arith.constant 0 : index
    %c0_5 = arith.constant 0 : index
    %6 = vector.load %arg4[%c0_4, %c0_5] : memref<1x512xf32, #tpu.memory_space<vmem>>, vector<1x512xf32>
    %7 = vector.broadcast %6 : vector<1x512xf32> to vector<32x512xf32>
    %8 = arith.addf %5, %7 : vector<32x512xf32>
    %c0_6 = arith.constant 0 : index
    %c0_7 = arith.constant 0 : index
    %9 = vector.load %arg11[%c0_6, %c0_7] : memref<32x512xf32, #tpu.memory_space<vmem>>, vector<32x512xf32>
    tpu.vector_store %arg11[%c0_6, %c0_7], %8 {strides = array<i32>} : memref<32x512xf32, #tpu.memory_space<vmem>>, vector<32x512xf32>,
    %c0_8 = arith.constant 0 : index
    %c0_9 = arith.constant 0 : index
    %c0_10 = arith.constant 0 : index
    %10 = vector.load %arg13[%c0_8, %c0_9, %c0_10] : memref<2x8x128xf32, #tpu.memory_space<vmem>>, vector<1x8x128xf32>
    %11 = vector.shape_cast %10 : vector<1x8x128xf32> to vector<8x128xf32>
    %c0_11 = arith.constant 0 : index
    %c0_12 = arith.constant 0 : index
    %c0_13 = arith.constant 0 : index
    %12 = vector.load %arg14[%c0_11, %c0_12, %c0_13] : memref<2x8x128xf32, #tpu.memory_space<vmem>>, vector<1x8x128xf32>
    %13 = vector.shape_cast %12 : vector<1x8x128xf32> to vector<8x128xf32>
    %c0_i32_14 = arith.constant 0 : i32
    %c8_i32 = arith.constant 8 : i32
    %14 = arith.muli %c0_i32_14, %c8_i32 : i32
    %15 = tpu.assume_multiple %14, 8 : i32
    %16 = arith.index_cast %15 : i32 to index
    %c0_15 = arith.constant 0 : index
    %17 = vector.load %arg11[%16, %c0_15] : memref<32x512xf32, #tpu.memory_space<vmem>>, vector<8x512xf32>
    %c0_16 = arith.constant 0 : index
    %c0_17 = arith.constant 0 : index
    %18 = vector.load %arg3[%c0_16, %c0_17] : memref<128x512xf32, #tpu.memory_space<vmem>>, vector<128x512xf32>
    %cst_18 = arith.constant dense<0.000000e+00> : vector<8x512xf32>
    %19 = tpu.matmul %11, %18, %cst_18 {dimension_numbers = #tpu.dot_dimension_numbers<[1], [0], [0], [1], [0, 0, 1, 1], [], []>} : vector<8x128xf32>, vector<128x512xf32>, vector<8x512xf32> -> vector<8x512xf32>
    %20 = arith.addf %17, %19 : vector<8x512xf32>
    %21 = vector.extract_strided_slice %20 {offsets = [0, 0], sizes = [8, 384], strides = [1, 1]} : vector<8x512xf32> to vector<8x384xf32>
    %22 = arith.negf %21 : vector<8x384xf32>
    %23 = math.exp %22 : vector<8x384xf32>
    %cst_19 = arith.constant 1.000000e+00 : f32
    %24 = vector.broadcast %cst_19 : f32 to vector<8x384xf32>
    %25 = arith.addf %24, %23 : vector<8x384xf32>
    %26 = arith.divf %24, %25 : vector<8x384xf32>
    %27 = vector.extract_strided_slice %20 {offsets = [0, 384], sizes = [8, 128], strides = [1, 1]} : vector<8x512xf32> to vector<8x128xf32>
    %28 = math.tanh %27 : vector<8x128xf32>
    %29 = vector.extract_strided_slice %26 {offsets = [0, 0], sizes = [8, 128], strides = [1, 1]} : vector<8x384xf32> to vector<8x128xf32>
    %30 = vector.extract_strided_slice %26 {offsets = [0, 128], sizes = [8, 128], strides = [1, 1]} : vector<8x384xf32> to vector<8x128xf32>
    %31 = vector.extract_strided_slice %26 {offsets = [0, 256], sizes = [8, 128], strides = [1, 1]} : vector<8x384xf32> to vector<8x128xf32>
    %32 = arith.mulf %30, %13 : vector<8x128xf32>
    %33 = arith.mulf %29, %28 : vector<8x128xf32>
    %34 = arith.addf %32, %33 : vector<8x128xf32>
    %35 = math.tanh %34 : vector<8x128xf32>
    %36 = arith.mulf %31, %35 : vector<8x128xf32>
    %37 = arith.index_cast %15 : i32 to index
    %c0_20 = arith.constant 0 : index
    %38 = vector.load %arg12[%37, %c0_20] : memref<32x128xf32, #tpu.memory_space<vmem>>, vector<8x128xf32>
    tpu.vector_store %arg12[%37, %c0_20], %36 {strides = array<i32>} : memref<32x128xf32, #tpu.memory_space<vmem>>, vector<8x128xf32>,
    %c1_i32 = arith.constant 1 : i32
    %c8_i32_21 = arith.constant 8 : i32
    %39 = arith.muli %c1_i32, %c8_i32_21 : i32
    %40 = tpu.assume_multiple %39, 8 : i32
    %41 = arith.index_cast %40 : i32 to index
    %c0_22 = arith.constant 0 : index
    %42 = vector.load %arg11[%41, %c0_22] : memref<32x512xf32, #tpu.memory_space<vmem>>, vector<8x512xf32>
    %c0_23 = arith.constant 0 : index
    %c0_24 = arith.constant 0 : index
    %43 = vector.load %arg3[%c0_23, %c0_24] : memref<128x512xf32, #tpu.memory_space<vmem>>, vector<128x512xf32>
    %cst_25 = arith.constant dense<0.000000e+00> : vector<8x512xf32>
    %44 = tpu.matmul %36, %43, %cst_25 {dimension_numbers = #tpu.dot_dimension_numbers<[1], [0], [0], [1], [0, 0, 1, 1], [], []>} : vector<8x128xf32>, vector<128x512xf32>, vector<8x512xf32> -> vector<8x512xf32>
    %45 = arith.addf %42, %44 : vector<8x512xf32>
    %46 = vector.extract_strided_slice %45 {offsets = [0, 0], sizes = [8, 384], strides = [1, 1]} : vector<8x512xf32> to vector<8x384xf32>
    %47 = arith.negf %46 : vector<8x384xf32>
    %48 = math.exp %47 : vector<8x384xf32>
    %cst_26 = arith.constant 1.000000e+00 : f32
    %49 = vector.broadcast %cst_26 : f32 to vector<8x384xf32>
    %50 = arith.addf %49, %48 : vector<8x384xf32>
    %51 = arith.divf %49, %50 : vector<8x384xf32>
    %52 = vector.extract_strided_slice %45 {offsets = [0, 384], sizes = [8, 128], strides = [1, 1]} : vector<8x512xf32> to vector<8x128xf32>
    %53 = math.tanh %52 : vector<8x128xf32>
    %54 = vector.extract_strided_slice %51 {offsets = [0, 0], sizes = [8, 128], strides = [1, 1]} : vector<8x384xf32> to vector<8x128xf32>
    %55 = vector.extract_strided_slice %51 {offsets = [0, 128], sizes = [8, 128], strides = [1, 1]} : vector<8x384xf32> to vector<8x128xf32>
    %56 = vector.extract_strided_slice %51 {offsets = [0, 256], sizes = [8, 128], strides = [1, 1]} : vector<8x384xf32> to vector<8x128xf32>
    %57 = arith.mulf %55, %34 : vector<8x128xf32>
    %58 = arith.mulf %54, %53 : vector<8x128xf32>
    %59 = arith.addf %57, %58 : vector<8x128xf32>
    %60 = math.tanh %59 : vector<8x128xf32>
    %61 = arith.mulf %56, %60 : vector<8x128xf32>
    %62 = arith.index_cast %40 : i32 to index
    %c0_27 = arith.constant 0 : index
    %63 = vector.load %arg12[%62, %c0_27] : memref<32x128xf32, #tpu.memory_space<vmem>>, vector<8x128xf32>
    tpu.vector_store %arg12[%62, %c0_27], %61 {strides = array<i32>} : memref<32x128xf32, #tpu.memory_space<vmem>>, vector<8x128xf32>,
    %c2_i32 = arith.constant 2 : i32
    %c8_i32_28 = arith.constant 8 : i32
    %64 = arith.muli %c2_i32, %c8_i32_28 : i32
    %65 = tpu.assume_multiple %64, 8 : i32
    %66 = arith.index_cast %65 : i32 to index
    %c0_29 = arith.constant 0 : index
    %67 = vector.load %arg11[%66, %c0_29] : memref<32x512xf32, #tpu.memory_space<vmem>>, vector<8x512xf32>
    %c0_30 = arith.constant 0 : index
    %c0_31 = arith.constant 0 : index
    %68 = vector.load %arg3[%c0_30, %c0_31] : memref<128x512xf32, #tpu.memory_space<vmem>>, vector<128x512xf32>
    %cst_32 = arith.constant dense<0.000000e+00> : vector<8x512xf32>
    %69 = tpu.matmul %61, %68, %cst_32 {dimension_numbers = #tpu.dot_dimension_numbers<[1], [0], [0], [1], [0, 0, 1, 1], [], []>} : vector<8x128xf32>, vector<128x512xf32>, vector<8x512xf32> -> vector<8x512xf32>
    %70 = arith.addf %67, %69 : vector<8x512xf32>
    %71 = vector.extract_strided_slice %70 {offsets = [0, 0], sizes = [8, 384], strides = [1, 1]} : vector<8x512xf32> to vector<8x384xf32>
    %72 = arith.negf %71 : vector<8x384xf32>
    %73 = math.exp %72 : vector<8x384xf32>
    %cst_33 = arith.constant 1.000000e+00 : f32
    %74 = vector.broadcast %cst_33 : f32 to vector<8x384xf32>
    %75 = arith.addf %74, %73 : vector<8x384xf32>
    %76 = arith.divf %74, %75 : vector<8x384xf32>
    %77 = vector.extract_strided_slice %70 {offsets = [0, 384], sizes = [8, 128], strides = [1, 1]} : vector<8x512xf32> to vector<8x128xf32>
    %78 = math.tanh %77 : vector<8x128xf32>
    %79 = vector.extract_strided_slice %76 {offsets = [0, 0], sizes = [8, 128], strides = [1, 1]} : vector<8x384xf32> to vector<8x128xf32>
    %80 = vector.extract_strided_slice %76 {offsets = [0, 128], sizes = [8, 128], strides = [1, 1]} : vector<8x384xf32> to vector<8x128xf32>
    %81 = vector.extract_strided_slice %76 {offsets = [0, 256], sizes = [8, 128], strides = [1, 1]} : vector<8x384xf32> to vector<8x128xf32>
    %82 = arith.mulf %80, %59 : vector<8x128xf32>
    %83 = arith.mulf %79, %78 : vector<8x128xf32>
    %84 = arith.addf %82, %83 : vector<8x128xf32>
    %85 = math.tanh %84 : vector<8x128xf32>
    %86 = arith.mulf %81, %85 : vector<8x128xf32>
    %87 = arith.index_cast %65 : i32 to index
    %c0_34 = arith.constant 0 : index
    %88 = vector.load %arg12[%87, %c0_34] : memref<32x128xf32, #tpu.memory_space<vmem>>, vector<8x128xf32>
    tpu.vector_store %arg12[%87, %c0_34], %86 {strides = array<i32>} : memref<32x128xf32, #tpu.memory_space<vmem>>, vector<8x128xf32>,
    %c3_i32 = arith.constant 3 : i32
    %c8_i32_35 = arith.constant 8 : i32
    %89 = arith.muli %c3_i32, %c8_i32_35 : i32
    %90 = tpu.assume_multiple %89, 8 : i32
    %91 = arith.index_cast %90 : i32 to index
    %c0_36 = arith.constant 0 : index
    %92 = vector.load %arg11[%91, %c0_36] : memref<32x512xf32, #tpu.memory_space<vmem>>, vector<8x512xf32>
    %c0_37 = arith.constant 0 : index
    %c0_38 = arith.constant 0 : index
    %93 = vector.load %arg3[%c0_37, %c0_38] : memref<128x512xf32, #tpu.memory_space<vmem>>, vector<128x512xf32>
    %cst_39 = arith.constant dense<0.000000e+00> : vector<8x512xf32>
    %94 = tpu.matmul %86, %93, %cst_39 {dimension_numbers = #tpu.dot_dimension_numbers<[1], [0], [0], [1], [0, 0, 1, 1], [], []>} : vector<8x128xf32>, vector<128x512xf32>, vector<8x512xf32> -> vector<8x512xf32>
    %95 = arith.addf %92, %94 : vector<8x512xf32>
    %96 = vector.extract_strided_slice %95 {offsets = [0, 0], sizes = [8, 384], strides = [1, 1]} : vector<8x512xf32> to vector<8x384xf32>
    %97 = arith.negf %96 : vector<8x384xf32>
    %98 = math.exp %97 : vector<8x384xf32>
    %cst_40 = arith.constant 1.000000e+00 : f32
    %99 = vector.broadcast %cst_40 : f32 to vector<8x384xf32>
    %100 = arith.addf %99, %98 : vector<8x384xf32>
    %101 = arith.divf %99, %100 : vector<8x384xf32>
    %102 = vector.extract_strided_slice %95 {offsets = [0, 384], sizes = [8, 128], strides = [1, 1]} : vector<8x512xf32> to vector<8x128xf32>
    %103 = math.tanh %102 : vector<8x128xf32>
    %104 = vector.extract_strided_slice %101 {offsets = [0, 0], sizes = [8, 128], strides = [1, 1]} : vector<8x384xf32> to vector<8x128xf32>
    %105 = vector.extract_strided_slice %101 {offsets = [0, 128], sizes = [8, 128], strides = [1, 1]} : vector<8x384xf32> to vector<8x128xf32>
    %106 = vector.extract_strided_slice %101 {offsets = [0, 256], sizes = [8, 128], strides = [1, 1]} : vector<8x384xf32> to vector<8x128xf32>
    %107 = arith.mulf %105, %84 : vector<8x128xf32>
    %108 = arith.mulf %104, %103 : vector<8x128xf32>
    %109 = arith.addf %107, %108 : vector<8x128xf32>
    %110 = math.tanh %109 : vector<8x128xf32>
    %111 = arith.mulf %106, %110 : vector<8x128xf32>
    %112 = arith.index_cast %90 : i32 to index
    %c0_41 = arith.constant 0 : index
    %113 = vector.load %arg12[%112, %c0_41] : memref<32x128xf32, #tpu.memory_space<vmem>>, vector<8x128xf32>
    tpu.vector_store %arg12[%112, %c0_41], %111 {strides = array<i32>} : memref<32x128xf32, #tpu.memory_space<vmem>>, vector<8x128xf32>,
    %c4_i32 = arith.constant 4 : i32
    %c0_42 = arith.constant 0 : index
    %c0_43 = arith.constant 0 : index
    %c0_44 = arith.constant 0 : index
    %114 = vector.load %arg13[%c0_42, %c0_43, %c0_44] : memref<2x8x128xf32, #tpu.memory_space<vmem>>, vector<1x8x128xf32>
    %115 = vector.shape_cast %114 : vector<1x8x128xf32> to vector<8x128xf32>
    %116 = vector.shape_cast %111 : vector<8x128xf32> to vector<1x8x128xf32>
    tpu.vector_store %arg13[%c0_42, %c0_43, %c0_44], %116 {strides = array<i32>} : memref<2x8x128xf32, #tpu.memory_space<vmem>>, vector<1x8x128xf32>,
    %c0_45 = arith.constant 0 : index
    %c0_46 = arith.constant 0 : index
    %c0_47 = arith.constant 0 : index
    %117 = vector.load %arg14[%c0_45, %c0_46, %c0_47] : memref<2x8x128xf32, #tpu.memory_space<vmem>>, vector<1x8x128xf32>
    %118 = vector.shape_cast %117 : vector<1x8x128xf32> to vector<8x128xf32>
    %119 = vector.shape_cast %109 : vector<8x128xf32> to vector<1x8x128xf32>
    tpu.vector_store %arg14[%c0_45, %c0_46, %c0_47], %119 {strides = array<i32>} : memref<2x8x128xf32, #tpu.memory_space<vmem>>, vector<1x8x128xf32>,
    %c0_48 = arith.constant 0 : index
    %c0_49 = arith.constant 0 : index
    %120 = vector.load %arg12[%c0_48, %c0_49] : memref<32x128xf32, #tpu.memory_space<vmem>>, vector<32x128xf32>
    %c0_50 = arith.constant 0 : index
    %c0_51 = arith.constant 0 : index
    %121 = vector.load %arg5[%c0_50, %c0_51] : memref<128x512xf32, #tpu.memory_space<vmem>>, vector<128x512xf32>
    %cst_52 = arith.constant dense<0.000000e+00> : vector<32x512xf32>
    %122 = tpu.matmul %120, %121, %cst_52 {dimension_numbers = #tpu.dot_dimension_numbers<[1], [0], [0], [1], [0, 0, 1, 1], [], []>} : vector<32x128xf32>, vector<128x512xf32>, vector<32x512xf32> -> vector<32x512xf32>
    %c0_53 = arith.constant 0 : index
    %c0_54 = arith.constant 0 : index
    %123 = vector.load %arg7[%c0_53, %c0_54] : memref<1x512xf32, #tpu.memory_space<vmem>>, vector<1x512xf32>
    %124 = vector.broadcast %123 : vector<1x512xf32> to vector<32x512xf32>
    %125 = arith.addf %122, %124 : vector<32x512xf32>
    %c0_55 = arith.constant 0 : index
    %c0_56 = arith.constant 0 : index
    %126 = vector.load %arg11[%c0_55, %c0_56] : memref<32x512xf32, #tpu.memory_space<vmem>>, vector<32x512xf32>
    tpu.vector_store %arg11[%c0_55, %c0_56], %125 {strides = array<i32>} : memref<32x512xf32, #tpu.memory_space<vmem>>, vector<32x512xf32>,
    %c1 = arith.constant 1 : index
    %c0_57 = arith.constant 0 : index
    %c0_58 = arith.constant 0 : index
    %127 = vector.load %arg13[%c1, %c0_57, %c0_58] : memref<2x8x128xf32, #tpu.memory_space<vmem>>, vector<1x8x128xf32>
    %128 = vector.shape_cast %127 : vector<1x8x128xf32> to vector<8x128xf32>
    %c1_59 = arith.constant 1 : index
    %c0_60 = arith.constant 0 : index
    %c0_61 = arith.constant 0 : index
    %129 = vector.load %arg14[%c1_59, %c0_60, %c0_61] : memref<2x8x128xf32, #tpu.memory_space<vmem>>, vector<1x8x128xf32>
    %130 = vector.shape_cast %129 : vector<1x8x128xf32> to vector<8x128xf32>
    %c0_i32_62 = arith.constant 0 : i32
    %c8_i32_63 = arith.constant 8 : i32
    %131 = arith.muli %c0_i32_62, %c8_i32_63 : i32
    %132 = tpu.assume_multiple %131, 8 : i32
    %133 = arith.index_cast %132 : i32 to index
    %c0_64 = arith.constant 0 : index
    %134 = vector.load %arg11[%133, %c0_64] : memref<32x512xf32, #tpu.memory_space<vmem>>, vector<8x512xf32>
    %c0_65 = arith.constant 0 : index
    %c0_66 = arith.constant 0 : index
    %135 = vector.load %arg6[%c0_65, %c0_66] : memref<128x512xf32, #tpu.memory_space<vmem>>, vector<128x512xf32>
    %cst_67 = arith.constant dense<0.000000e+00> : vector<8x512xf32>
    %136 = tpu.matmul %128, %135, %cst_67 {dimension_numbers = #tpu.dot_dimension_numbers<[1], [0], [0], [1], [0, 0, 1, 1], [], []>} : vector<8x128xf32>, vector<128x512xf32>, vector<8x512xf32> -> vector<8x512xf32>
    %137 = arith.addf %134, %136 : vector<8x512xf32>
    %138 = vector.extract_strided_slice %137 {offsets = [0, 0], sizes = [8, 384], strides = [1, 1]} : vector<8x512xf32> to vector<8x384xf32>
    %139 = arith.negf %138 : vector<8x384xf32>
    %140 = math.exp %139 : vector<8x384xf32>
    %cst_68 = arith.constant 1.000000e+00 : f32
    %141 = vector.broadcast %cst_68 : f32 to vector<8x384xf32>
    %142 = arith.addf %141, %140 : vector<8x384xf32>
    %143 = arith.divf %141, %142 : vector<8x384xf32>
    %144 = vector.extract_strided_slice %137 {offsets = [0, 384], sizes = [8, 128], strides = [1, 1]} : vector<8x512xf32> to vector<8x128xf32>
    %145 = math.tanh %144 : vector<8x128xf32>
    %146 = vector.extract_strided_slice %143 {offsets = [0, 0], sizes = [8, 128], strides = [1, 1]} : vector<8x384xf32> to vector<8x128xf32>
    %147 = vector.extract_strided_slice %143 {offsets = [0, 128], sizes = [8, 128], strides = [1, 1]} : vector<8x384xf32> to vector<8x128xf32>
    %148 = vector.extract_strided_slice %143 {offsets = [0, 256], sizes = [8, 128], strides = [1, 1]} : vector<8x384xf32> to vector<8x128xf32>
    %149 = arith.mulf %147, %130 : vector<8x128xf32>
    %150 = arith.mulf %146, %145 : vector<8x128xf32>
    %151 = arith.addf %149, %150 : vector<8x128xf32>
    %152 = math.tanh %151 : vector<8x128xf32>
    %153 = arith.mulf %148, %152 : vector<8x128xf32>
    %154 = arith.index_cast %132 : i32 to index
    %c0_69 = arith.constant 0 : index
    %155 = vector.load %arg12[%154, %c0_69] : memref<32x128xf32, #tpu.memory_space<vmem>>, vector<8x128xf32>
    tpu.vector_store %arg12[%154, %c0_69], %153 {strides = array<i32>} : memref<32x128xf32, #tpu.memory_space<vmem>>, vector<8x128xf32>,
    %c1_i32_70 = arith.constant 1 : i32
    %c8_i32_71 = arith.constant 8 : i32
    %156 = arith.muli %c1_i32_70, %c8_i32_71 : i32
    %157 = tpu.assume_multiple %156, 8 : i32
    %158 = arith.index_cast %157 : i32 to index
    %c0_72 = arith.constant 0 : index
    %159 = vector.load %arg11[%158, %c0_72] : memref<32x512xf32, #tpu.memory_space<vmem>>, vector<8x512xf32>
    %c0_73 = arith.constant 0 : index
    %c0_74 = arith.constant 0 : index
    %160 = vector.load %arg6[%c0_73, %c0_74] : memref<128x512xf32, #tpu.memory_space<vmem>>, vector<128x512xf32>
    %cst_75 = arith.constant dense<0.000000e+00> : vector<8x512xf32>
    %161 = tpu.matmul %153, %160, %cst_75 {dimension_numbers = #tpu.dot_dimension_numbers<[1], [0], [0], [1], [0, 0, 1, 1], [], []>} : vector<8x128xf32>, vector<128x512xf32>, vector<8x512xf32> -> vector<8x512xf32>
    %162 = arith.addf %159, %161 : vector<8x512xf32>
    %163 = vector.extract_strided_slice %162 {offsets = [0, 0], sizes = [8, 384], strides = [1, 1]} : vector<8x512xf32> to vector<8x384xf32>
    %164 = arith.negf %163 : vector<8x384xf32>
    %165 = math.exp %164 : vector<8x384xf32>
    %cst_76 = arith.constant 1.000000e+00 : f32
    %166 = vector.broadcast %cst_76 : f32 to vector<8x384xf32>
    %167 = arith.addf %166, %165 : vector<8x384xf32>
    %168 = arith.divf %166, %167 : vector<8x384xf32>
    %169 = vector.extract_strided_slice %162 {offsets = [0, 384], sizes = [8, 128], strides = [1, 1]} : vector<8x512xf32> to vector<8x128xf32>
    %170 = math.tanh %169 : vector<8x128xf32>
    %171 = vector.extract_strided_slice %168 {offsets = [0, 0], sizes = [8, 128], strides = [1, 1]} : vector<8x384xf32> to vector<8x128xf32>
    %172 = vector.extract_strided_slice %168 {offsets = [0, 128], sizes = [8, 128], strides = [1, 1]} : vector<8x384xf32> to vector<8x128xf32>
    %173 = vector.extract_strided_slice %168 {offsets = [0, 256], sizes = [8, 128], strides = [1, 1]} : vector<8x384xf32> to vector<8x128xf32>
    %174 = arith.mulf %172, %151 : vector<8x128xf32>
    %175 = arith.mulf %171, %170 : vector<8x128xf32>
    %176 = arith.addf %174, %175 : vector<8x128xf32>
    %177 = math.tanh %176 : vector<8x128xf32>
    %178 = arith.mulf %173, %177 : vector<8x128xf32>
    %179 = arith.index_cast %157 : i32 to index
    %c0_77 = arith.constant 0 : index
    %180 = vector.load %arg12[%179, %c0_77] : memref<32x128xf32, #tpu.memory_space<vmem>>, vector<8x128xf32>
    tpu.vector_store %arg12[%179, %c0_77], %178 {strides = array<i32>} : memref<32x128xf32, #tpu.memory_space<vmem>>, vector<8x128xf32>,
    %c2_i32_78 = arith.constant 2 : i32
    %c8_i32_79 = arith.constant 8 : i32
    %181 = arith.muli %c2_i32_78, %c8_i32_79 : i32
    %182 = tpu.assume_multiple %181, 8 : i32
    %183 = arith.index_cast %182 : i32 to index
    %c0_80 = arith.constant 0 : index
    %184 = vector.load %arg11[%183, %c0_80] : memref<32x512xf32, #tpu.memory_space<vmem>>, vector<8x512xf32>
    %c0_81 = arith.constant 0 : index
    %c0_82 = arith.constant 0 : index
    %185 = vector.load %arg6[%c0_81, %c0_82] : memref<128x512xf32, #tpu.memory_space<vmem>>, vector<128x512xf32>
    %cst_83 = arith.constant dense<0.000000e+00> : vector<8x512xf32>
    %186 = tpu.matmul %178, %185, %cst_83 {dimension_numbers = #tpu.dot_dimension_numbers<[1], [0], [0], [1], [0, 0, 1, 1], [], []>} : vector<8x128xf32>, vector<128x512xf32>, vector<8x512xf32> -> vector<8x512xf32>
    %187 = arith.addf %184, %186 : vector<8x512xf32>
    %188 = vector.extract_strided_slice %187 {offsets = [0, 0], sizes = [8, 384], strides = [1, 1]} : vector<8x512xf32> to vector<8x384xf32>
    %189 = arith.negf %188 : vector<8x384xf32>
    %190 = math.exp %189 : vector<8x384xf32>
    %cst_84 = arith.constant 1.000000e+00 : f32
    %191 = vector.broadcast %cst_84 : f32 to vector<8x384xf32>
    %192 = arith.addf %191, %190 : vector<8x384xf32>
    %193 = arith.divf %191, %192 : vector<8x384xf32>
    %194 = vector.extract_strided_slice %187 {offsets = [0, 384], sizes = [8, 128], strides = [1, 1]} : vector<8x512xf32> to vector<8x128xf32>
    %195 = math.tanh %194 : vector<8x128xf32>
    %196 = vector.extract_strided_slice %193 {offsets = [0, 0], sizes = [8, 128], strides = [1, 1]} : vector<8x384xf32> to vector<8x128xf32>
    %197 = vector.extract_strided_slice %193 {offsets = [0, 128], sizes = [8, 128], strides = [1, 1]} : vector<8x384xf32> to vector<8x128xf32>
    %198 = vector.extract_strided_slice %193 {offsets = [0, 256], sizes = [8, 128], strides = [1, 1]} : vector<8x384xf32> to vector<8x128xf32>
    %199 = arith.mulf %197, %176 : vector<8x128xf32>
    %200 = arith.mulf %196, %195 : vector<8x128xf32>
    %201 = arith.addf %199, %200 : vector<8x128xf32>
    %202 = math.tanh %201 : vector<8x128xf32>
    %203 = arith.mulf %198, %202 : vector<8x128xf32>
    %204 = arith.index_cast %182 : i32 to index
    %c0_85 = arith.constant 0 : index
    %205 = vector.load %arg12[%204, %c0_85] : memref<32x128xf32, #tpu.memory_space<vmem>>, vector<8x128xf32>
    tpu.vector_store %arg12[%204, %c0_85], %203 {strides = array<i32>} : memref<32x128xf32, #tpu.memory_space<vmem>>, vector<8x128xf32>,
    %c3_i32_86 = arith.constant 3 : i32
    %c8_i32_87 = arith.constant 8 : i32
    %206 = arith.muli %c3_i32_86, %c8_i32_87 : i32
    %207 = tpu.assume_multiple %206, 8 : i32
    %208 = arith.index_cast %207 : i32 to index
    %c0_88 = arith.constant 0 : index
    %209 = vector.load %arg11[%208, %c0_88] : memref<32x512xf32, #tpu.memory_space<vmem>>, vector<8x512xf32>
    %c0_89 = arith.constant 0 : index
    %c0_90 = arith.constant 0 : index
    %210 = vector.load %arg6[%c0_89, %c0_90] : memref<128x512xf32, #tpu.memory_space<vmem>>, vector<128x512xf32>
    %cst_91 = arith.constant dense<0.000000e+00> : vector<8x512xf32>
    %211 = tpu.matmul %203, %210, %cst_91 {dimension_numbers = #tpu.dot_dimension_numbers<[1], [0], [0], [1], [0, 0, 1, 1], [], []>} : vector<8x128xf32>, vector<128x512xf32>, vector<8x512xf32> -> vector<8x512xf32>
    %212 = arith.addf %209, %211 : vector<8x512xf32>
    %213 = vector.extract_strided_slice %212 {offsets = [0, 0], sizes = [8, 384], strides = [1, 1]} : vector<8x512xf32> to vector<8x384xf32>
    %214 = arith.negf %213 : vector<8x384xf32>
    %215 = math.exp %214 : vector<8x384xf32>
    %cst_92 = arith.constant 1.000000e+00 : f32
    %216 = vector.broadcast %cst_92 : f32 to vector<8x384xf32>
    %217 = arith.addf %216, %215 : vector<8x384xf32>
    %218 = arith.divf %216, %217 : vector<8x384xf32>
    %219 = vector.extract_strided_slice %212 {offsets = [0, 384], sizes = [8, 128], strides = [1, 1]} : vector<8x512xf32> to vector<8x128xf32>
    %220 = math.tanh %219 : vector<8x128xf32>
    %221 = vector.extract_strided_slice %218 {offsets = [0, 0], sizes = [8, 128], strides = [1, 1]} : vector<8x384xf32> to vector<8x128xf32>
    %222 = vector.extract_strided_slice %218 {offsets = [0, 128], sizes = [8, 128], strides = [1, 1]} : vector<8x384xf32> to vector<8x128xf32>
    %223 = vector.extract_strided_slice %218 {offsets = [0, 256], sizes = [8, 128], strides = [1, 1]} : vector<8x384xf32> to vector<8x128xf32>
    %224 = arith.mulf %222, %201 : vector<8x128xf32>
    %225 = arith.mulf %221, %220 : vector<8x128xf32>
    %226 = arith.addf %224, %225 : vector<8x128xf32>
    %227 = math.tanh %226 : vector<8x128xf32>
    %228 = arith.mulf %223, %227 : vector<8x128xf32>
    %229 = arith.index_cast %207 : i32 to index
    %c0_93 = arith.constant 0 : index
    %230 = vector.load %arg12[%229, %c0_93] : memref<32x128xf32, #tpu.memory_space<vmem>>, vector<8x128xf32>
    tpu.vector_store %arg12[%229, %c0_93], %228 {strides = array<i32>} : memref<32x128xf32, #tpu.memory_space<vmem>>, vector<8x128xf32>,
    %c4_i32_94 = arith.constant 4 : i32
    %c1_95 = arith.constant 1 : index
    %c0_96 = arith.constant 0 : index
    %c0_97 = arith.constant 0 : index
    %231 = vector.load %arg13[%c1_95, %c0_96, %c0_97] : memref<2x8x128xf32, #tpu.memory_space<vmem>>, vector<1x8x128xf32>
    %232 = vector.shape_cast %231 : vector<1x8x128xf32> to vector<8x128xf32>
    %233 = vector.shape_cast %228 : vector<8x128xf32> to vector<1x8x128xf32>
    tpu.vector_store %arg13[%c1_95, %c0_96, %c0_97], %233 {strides = array<i32>} : memref<2x8x128xf32, #tpu.memory_space<vmem>>, vector<1x8x128xf32>,
    %c1_98 = arith.constant 1 : index
    %c0_99 = arith.constant 0 : index
    %c0_100 = arith.constant 0 : index
    %234 = vector.load %arg14[%c1_98, %c0_99, %c0_100] : memref<2x8x128xf32, #tpu.memory_space<vmem>>, vector<1x8x128xf32>
    %235 = vector.shape_cast %234 : vector<1x8x128xf32> to vector<8x128xf32>
    %236 = vector.shape_cast %226 : vector<8x128xf32> to vector<1x8x128xf32>
    tpu.vector_store %arg14[%c1_98, %c0_99, %c0_100], %236 {strides = array<i32>} : memref<2x8x128xf32, #tpu.memory_space<vmem>>, vector<1x8x128xf32>,
    %c0_101 = arith.constant 0 : index
    %c0_102 = arith.constant 0 : index
    %237 = vector.load %arg12[%c0_101, %c0_102] : memref<32x128xf32, #tpu.memory_space<vmem>>, vector<32x128xf32>
    %c0_103 = arith.constant 0 : index
    %c0_104 = arith.constant 0 : index
    %238 = vector.load %arg8[%c0_103, %c0_104] : memref<128x128xf32, #tpu.memory_space<vmem>>, vector<128x128xf32>
    %cst_105 = arith.constant dense<0.000000e+00> : vector<32x128xf32>
    %239 = tpu.matmul %237, %238, %cst_105 {dimension_numbers = #tpu.dot_dimension_numbers<[1], [0], [0], [1], [0, 0, 1, 1], [], []>} : vector<32x128xf32>, vector<128x128xf32>, vector<32x128xf32> -> vector<32x128xf32>
    %c0_106 = arith.constant 0 : index
    %c0_107 = arith.constant 0 : index
    %240 = vector.load %arg9[%c0_106, %c0_107] : memref<1x128xf32, #tpu.memory_space<vmem>>, vector<1x128xf32>
    %241 = vector.broadcast %240 : vector<1x128xf32> to vector<32x128xf32>
    %242 = arith.addf %239, %241 : vector<32x128xf32>
    %c0_108 = arith.constant 0 : index
    %c0_109 = arith.constant 0 : index
    %243 = vector.load %arg10[%c0_108, %c0_109] : memref<32x128xf32, #tpu.memory_space<vmem>>, vector<32x128xf32>
    tpu.vector_store %arg10[%c0_108, %c0_109], %242 {strides = array<i32>} : memref<32x128xf32, #tpu.memory_space<vmem>>, vector<32x128xf32>,
    return
  }
  func.func @transform_0(%arg0: i32) -> (i32, i32) {
    %c0_i32 = arith.constant 0 : i32
    %c0_i32_0 = arith.constant 0 : i32
    return %arg0, %c0_i32 : i32, i32
  }
  func.func @transform_1(%arg0: i32) -> (i32, i32) {
    %c0_i32 = arith.constant 0 : i32
    %c0_i32_0 = arith.constant 0 : i32
    %c0_i32_1 = arith.constant 0 : i32
    return %c0_i32, %c0_i32_0 : i32, i32
  }
  func.func @transform_2(%arg0: i32) -> (i32, i32) {
    %c0_i32 = arith.constant 0 : i32
    %c0_i32_0 = arith.constant 0 : i32
    %c0_i32_1 = arith.constant 0 : i32
    return %c0_i32, %c0_i32_0 : i32, i32
  }
  func.func @transform_3(%arg0: i32) -> (i32, i32) {
    %c0_i32 = arith.constant 0 : i32
    %c0_i32_0 = arith.constant 0 : i32
    %c0_i32_1 = arith.constant 0 : i32
    return %c0_i32, %c0_i32_0 : i32, i32
  }
  func.func @transform_4(%arg0: i32) -> (i32, i32) {
    %c0_i32 = arith.constant 0 : i32
    %c0_i32_0 = arith.constant 0 : i32
    %c0_i32_1 = arith.constant 0 : i32
    return %c0_i32, %c0_i32_0 : i32, i32
  }
  func.func @transform_5(%arg0: i32) -> (i32, i32) {
    %c0_i32 = arith.constant 0 : i32
    %c0_i32_0 = arith.constant 0 : i32
    %c0_i32_1 = arith.constant 0 : i32
    return %c0_i32, %c0_i32_0 : i32, i32
  }
  func.func @transform_6(%arg0: i32) -> (i32, i32) {
    %c0_i32 = arith.constant 0 : i32
    %c0_i32_0 = arith.constant 0 : i32
    %c0_i32_1 = arith.constant 0 : i32
    return %c0_i32, %c0_i32_0 : i32, i32
  }
  func.func @transform_7(%arg0: i32) -> (i32, i32) {
    %c0_i32 = arith.constant 0 : i32
    %c0_i32_0 = arith.constant 0 : i32
    %c0_i32_1 = arith.constant 0 : i32
    return %c0_i32, %c0_i32_0 : i32, i32
  }
  func.func @transform_8(%arg0: i32) -> (i32, i32) {
    %c0_i32 = arith.constant 0 : i32
    %c0_i32_0 = arith.constant 0 : i32
    %c0_i32_1 = arith.constant 0 : i32
    return %c0_i32, %c0_i32_0 : i32, i32
  }
  func.func @transform_9(%arg0: i32) -> (i32, i32) {
    %c0_i32 = arith.constant 0 : i32
    %c0_i32_0 = arith.constant 0 : i32
    return %arg0, %c0_i32 : i32, i32
  }
}

</mosaic_0001>

<bundles_post_ra>
// kernel: our_lstm_forward.1
= control target key start
LH: loop header
LB: loop body
LE: loop exit
PB: predicated region body
PF: predicated region fallthrough
CT: control target
= control target key end

     0   :  { %14 = vsyncpa [#allocation7], 0  ;;  %s4984_s0 = inlined_call_operand.vmem [shape: f32[64,4], index: 0, kind: input, shape index: {}]   ;;  %s4985_s1 = inlined_call_operand.vmem [shape: f32[4,512], index: 1, kind: input, shape index: {}]   ;;  %s4986_s2 = inlined_call_operand.hbm [shape: f32[128,512], index: 2, kind: input, shape index: {}]   ;;  %s4987_s3 = inlined_call_operand.vmem [shape: f32[1,512], index: 3, kind: input, shape index: {}]   ;;  %s4988_s4 = inlined_call_operand.hbm [shape: f32[128,512], index: 4, kind: input, shape index: {}]   ;;  %s4989_s5 = inlined_call_operand.hbm [shape: f32[128,512], index: 5, kind: input, shape index: {}]   ;;  %s4990_s6 = inlined_call_operand.vmem [shape: f32[1,512], index: 6, kind: input, shape index: {}]   ;;  %s4991_s7 = inlined_call_operand.hbm [shape: f32[128,128], index: 7, kind: input, shape index: {}]   ;;  %s4992_s8 = inlined_call_operand.vmem [shape: f32[1,128], index: 8, kind: input, shape index: {}]   ;;  %s4993_s9 = inlined_call_operand.vmem [shape: f32[64,128], index: 9, kind: output, shape index: {}]  }
   0x1   :  { %15 = vsyncpa [#allocation9], 0 }
   0x2   :  { %16 = vsyncpa [#allocation12], 0  ;;  %s4252_s30 = smov 0  }
   0x3 LB: > { %s4258_s10 = sadd.s32 4294967295, %s4190_s30   ;;  %p3090_p0 = scmp.ge.s32.totalorder %s4190_s30, 1  ;;  %s4190_s30 = sphi %s4252_s30, %s22_s30  }
   0x4   : > { %p247_p1 = scmp.lt.s32.totalorder %s4190_s30, 3  ;;  %p4994_p3 = scmp.eq.s32.totalorder %s4258_s10, 0 }
   0x5   : > { %s4192_s12 = smov [#allocation8]   ;;  %s4193_s14 = smov [#allocation6]  }
   0x6   : > { %p4264_p4 = pnand %p3090_p0, %p247_p1  ;;  %s278_s13 = sshll.u32 %s4192_s12, 4  ;;  %s4268_s13 = int_to_ptr.vmem [resolvable:$true] %s278_s13 }
   0x7   : > { %s262_s15 = sshll.u32 %s4193_s14, 4  ;;  %s4194_s17 = smov [#allocation10]   ;;  %s4272_s15 = int_to_ptr.vmem [resolvable:$true] %s262_s15 }
   0x8   : > { %s4999_s11 = scalar_select %p4264_p4, 1, 0 }
   0x9   : > { %p3891_p5 = pneg %p4264_p4  ;;  %s291_s18 = sshll.u32 %s4194_s17, 4  ;;  %s4280_s18 = int_to_ptr.vmem [resolvable:$true] %s291_s18 }
   0xa   : > { %s4195_s19 = smov [#allocation11]   ;;  %s4060_s23 = scalar_lea.hbm %s4988_s4, 8192 }
   0xb   : > { %p4276_p6 = pnand %p4994_p3, %p3891_p5  ;;  %s4282_s20 = sshll.u32 %s4195_s19, 4  ;;  %s308_s20 = int_to_ptr.vmem [resolvable:$true] %s4282_s20 }
   0xc   : > { %p4061_p7 = scmp.ne.s32.totalorder %s4988_s4, %s4060_s23  ;;  %p4067_p11 = scmp.lt.u32.totalorder %s4060_s23, %s4988_s4 }
   0xd   : > { %p4292_p8 = pneg %p4276_p6 }
   0xf   : > { %p4063_p9 = pnand %p4292_p8, %p4061_p7 }
  0x11   : > { %p4064_p10 = pneg %p4063_p9 }
  0x13   : > { %p4069_p12 = pnand %p4067_p11, %p4064_p10 }
  0x15   : > { %4072 = shalt.err (!%p4069_p12)
}
  0x16   : > { %s4073_s29 = scalar_lea.vmem %s4268_s13, 8192  ;;  %p4081_p5 = scmp.lt.s32.totalorder %s4268_s13, %s4268_s13 }
  0x17   : > { %p4074_p13 = scmp.ne.s32.totalorder %s4268_s13, %s4073_s29  ;;  %p4082_p2 = scmp.lt.s32.totalorder %s4073_s29, %s4073_s29 }
  0x19   : > { %p4076_p0 = pnand %p4074_p13, %p4292_p8  ;;  %p4083_p7 = por %p4082_p2, %p4081_p5 }
  0x1b   : > { %p4077_p1 = pneg %p4076_p0 }
  0x1d   : > { %p4084_p9 = pnand %p4083_p7, %p4077_p1 }
  0x1f   : > { %4087 = shalt.err (!%p4084_p9)
}
  0x20   : > { %s4196_s12 = smov 512   ;;  %s4197_s14 = smov 32  }
  0x21   : > { %3897 = dma.hbm_to_vmem [thread:$0]  (!%p4276_p6), %s4988_s4, 8192, %s4268_s13, [#allocation9], %s4196_s12, %s4196_s12, %s4197_s14  }
  0x22   : > { %s4088_s23 = scalar_lea.hbm %s4986_s2, 8192 }
  0x23   : > { %p4089_p2 = scmp.ne.s32.totalorder %s4986_s2, %s4088_s23  ;;  %p4095_p12 = scmp.lt.u32.totalorder %s4088_s23, %s4986_s2 }
  0x25   : > { %p4091_p10 = pnand %p4089_p2, %p4292_p8 }
  0x27   : > { %p4092_p11 = pneg %p4091_p10 }
  0x29   : > { %p4097_p13 = pnand %p4095_p12, %p4092_p11 }
  0x2b   : > { %4100 = shalt.err (!%p4097_p13)
}
  0x2c   : > { %s4101_s13 = scalar_lea.vmem %s4272_s15, 8192  ;;  %p4109_p7 = scmp.lt.s32.totalorder %s4272_s15, %s4272_s15 }
  0x2d   : > { %p4102_p0 = scmp.ne.s32.totalorder %s4272_s15, %s4101_s13  ;;  %p4110_p9 = scmp.lt.s32.totalorder %s4101_s13, %s4101_s13 }
  0x2f   : > { %p4104_p1 = pnand %p4102_p0, %p4292_p8  ;;  %p4111_p2 = por %p4110_p9, %p4109_p7 }
  0x31   : > { %p4105_p5 = pneg %p4104_p1 }
  0x33   : > { %p4112_p10 = pnand %p4111_p2, %p4105_p5 }
  0x35   : > { %4115 = shalt.err (!%p4112_p10)
}
  0x36   : > { %3894 = dma.hbm_to_vmem [thread:$0]  (!%p4276_p6), %s4986_s2, 8192, %s4272_s15, [#allocation7], %s4196_s12, %s4196_s12, %s4197_s14  }
  0x37   : > { %s4116_s22 = scalar_lea.hbm %s4989_s5, 8192 }
  0x38   : > { %p4117_p11 = scmp.ne.s32.totalorder %s4989_s5, %s4116_s22  ;;  %p4123_p0 = scmp.lt.u32.totalorder %s4116_s22, %s4989_s5 }
  0x3a   : > { %p4119_p12 = pnand %p4117_p11, %p4292_p8 }
  0x3c   : > { %p4120_p13 = pneg %p4119_p12 }
  0x3e   : > { %p4125_p1 = pnand %p4123_p0, %p4120_p13 }
  0x40   : > { %4128 = shalt.err (!%p4125_p1)
}
  0x41   : > { %s4129_s15 = scalar_lea.vmem %s4280_s18, 8192  ;;  %p4137_p2 = scmp.lt.s32.totalorder %s4280_s18, %s4280_s18 }
  0x42   : > { %p4130_p5 = scmp.ne.s32.totalorder %s4280_s18, %s4129_s15  ;;  %p4138_p10 = scmp.lt.s32.totalorder %s4129_s15, %s4129_s15 }
  0x44   : > { %p4132_p7 = pnand %p4130_p5, %p4292_p8  ;;  %p4139_p11 = por %p4138_p10, %p4137_p2 }
  0x46   : > { %p4133_p9 = pneg %p4132_p7 }
  0x48   : > { %p4140_p12 = pnand %p4139_p11, %p4133_p9 }
  0x4a   : > { %4143 = shalt.err (!%p4140_p12)
}
  0x4b   : > { %3900 = dma.hbm_to_vmem [thread:$0]  (!%p4276_p6), %s4989_s5, 8192, %s4280_s18, [#allocation9], %s4196_s12, %s4196_s12, %s4197_s14  }
  0x4c   : > { %s4144_s19 = scalar_lea.hbm %s4991_s7, 2048 }
  0x4d   : > { %p4145_p13 = scmp.ne.s32.totalorder %s4991_s7, %s4144_s19  ;;  %p4151_p5 = scmp.lt.u32.totalorder %s4144_s19, %s4991_s7 }
  0x4f   : > { %p4147_p0 = pnand %p4145_p13, %p4292_p8 }
  0x51   : > { %p4148_p1 = pneg %p4147_p0 }
  0x53   : > { %p4153_p7 = pnand %p4151_p5, %p4148_p1 }
  0x55   : > { %4156 = shalt.err (!%p4153_p7)
}
  0x56   : > { %s4157_s25 = scalar_lea.vmem %s308_s20, 2048  ;;  %p4165_p11 = scmp.lt.s32.totalorder %s308_s20, %s308_s20 }
  0x57   : > { %p4158_p9 = scmp.ne.s32.totalorder %s308_s20, %s4157_s25  ;;  %p4166_p12 = scmp.lt.s32.totalorder %s4157_s25, %s4157_s25 }
  0x59   : > { %p4160_p2 = pnand %p4158_p9, %p4292_p8  ;;  %p4167_p3 = por %p4166_p12, %p4165_p11 }
  0x5b   : > { %p4161_p10 = pneg %p4160_p2 }
  0x5d   : > { %p4168_p4 = pnand %p4167_p3, %p4161_p10 }
  0x5f   : > { %4171 = shalt.err (!%p4168_p4)
}
  0x60   : > { %s4198_s18 = smov 128   ;;  %s4199_s12 = smov 8  }
  0x61   : > { %3903 = dma.hbm_to_vmem [thread:$0]  (!%p4276_p6), %s4991_s7, 2048, %s308_s20, [#allocation12], %s4198_s18, %s4198_s18, %s4199_s12  }
  0x62   : > { %p5002_p13 = scmp.ne.s32.totalorder %s4999_s11, 0 }
  0x63   : > { %p5003_p0 = scmp.eq.s32.totalorder (!%p5002_p13), %s4258_s10, 0 }
  0x64   : > { %335 = sbr.rel (%p5002_p13) target bundleno = 2460 (0x99c), region = 56 }
  0x6b   : > { %4177 = dma.done.wait (%p5003_p0), [#allocation7], 8192   ;;  %p5004_p8 = pmov %p5003_p0 }
  0x6c   : > { %p5005_p3 = pmov %p5003_p0 }
  0x6d   : > { %4179 = vsyncadd (%p5004_p8), [#allocation7], 4294959104 }
  0x6e   : > { %4181 = dma.done.wait (%p5005_p3), [#allocation9], 16384   ;;  %p5006_p4 = pmov %p5003_p0 }
  0x6f   : > { %p5007_p1 = pmov %p5003_p0 }
  0x70   : > { %4183 = vsyncadd (%p5006_p4), [#allocation9], 4294950912 }
  0x71   : > { %4185 = dma.done.wait (%p5007_p1), [#allocation12], 2048   ;;  %p5008_p6 = pmov %p5003_p0 }
  0x72   : > { %s3101_s11 = sshll.u32 %s4258_s10, 2  ;;  %p5009_p7 = scmp.ne.s32.totalorder %s4258_s10, 0 }
  0x73   : > { %4187 = vsyncadd (%p5008_p6), [#allocation12], 4294965248  ;;  %p384_p5 = scmp.lt.s32.totalorder %s3101_s11, 7  ;;  %v4200_v0 = vmov (!%p5009_p7), 0.0  }
  0x74   : > { %398 = sbr.rel (%p5009_p7) target bundleno = 123 (0x7b), region = 76  ;;  %399 = vst [vmem:[#allocation4] sm:$0xff] (!%p5009_p7), %v4200_v0  ;;  %400 = vst [vmem:[#allocation4 + $0x8] sm:$0xff] (!%p5009_p7), %v4200_v0 }
  0x75   : > { %s5014_s11 = smov (!%p384_p5, %s3101_s11), 7  ;;  %401 = vst [vmem:[#allocation5] sm:$0xff] (!%p5009_p7), %v4200_v0  ;;  %402 = vst [vmem:[#allocation5 + $0x8] sm:$0xff] (!%p5009_p7), %v4200_v0 }
  0x76   : > { %s3102_s16 = sshll.u32 %s5014_s11, 3 }
  0x77   : > { %s4405_s15 = scalar_lea.vmem %s4984_s0, %s3102_s16  ;;  %s4410_s29 = scalar_lea.vmem %s4993_s9, %s3102_s16 }
  0x7b PF: > { %v661_v1 = vld [vmem:[#allocation6 + $0x8] sm:$0xff]  ;;  %v660_v3 = vld [vmem:[#allocation6] sm:$0xff]  ;;  %v4201_v8 = vmov 0.0   ;;  %vm448_vm0 = vcmask 1043456   ;;  %vm435_vm1 = vcmask 31744   ;;  %v405_v46 = vld [vmem:[%s4405_s15 + $0x10] sm:$0xff] }
  0x7c   : > { %v665_v2 = vld [vmem:[#allocation6 + $0x28] sm:$0xff]  ;;  %v664_v5 = vld [vmem:[#allocation6 + $0x20] sm:$0xff]  ;;  %521 = vmatprep.mubr.f32.mxu0 %v4201_v8  ;;  %788 = vmatprep.mubr.f32.mxu1 %v4201_v8  ;;  %v406_v53 = vld [vmem:[%s4405_s15 + $0x18] sm:$0xff] }
  0x7d   : > { %v4414_v4 = vpack.c.bf16 %v665_v2, %v661_v1  ;;  %v669_v6 = vld [vmem:[#allocation6 + $0x48] sm:$0xff]  ;;  %v4418_v9 = vpack.c.bf16 %v664_v5, %v660_v3  ;;  %v668_v11 = vld [vmem:[#allocation6 + $0x40] sm:$0xff]  ;;  %v663_v57 = vld [vmem:[#allocation6 + $0x18] sm:$0xff] }
  0x7e   : > { %v673_v7 = vld [vmem:[#allocation6 + $0x68] sm:$0xff]  ;;  %v672_v12 = vld [vmem:[#allocation6 + $0x60] sm:$0xff]  ;;  %v667_v58 = vld [vmem:[#allocation6 + $0x38] sm:$0xff] }
  0x7f   : > { %v4420_v10 = vpack.c.bf16 %v673_v7, %v669_v6  ;;  %v677_v13 = vld [vmem:[#allocation6 + $0x88] sm:$0xff]  ;;  %3204 = vmatprep.subr.bf16.mxu1 %v4414_v4  ;;  %v4424_v15 = vpack.c.bf16 %v672_v12, %v668_v11  ;;  %v676_v17 = vld [vmem:[#allocation6 + $0x80] sm:$0xff]  ;;  %v4486_v60 = vpack.c.bf16 %v667_v58, %v663_v57  ;;  %v662_v61 = vld [vmem:[#allocation6 + $0x10] sm:$0xff] }
  0x80   : > { %v681_v14 = vld [vmem:[#allocation6 + $0xa8] sm:$0xff]  ;;  %3206 = vmatpush1.bf16.msra.mxu1 %v4418_v9  ;;  %v680_v18 = vld [vmem:[#allocation6 + $0xa0] sm:$0xff]  ;;  %v666_v62 = vld [vmem:[#allocation6 + $0x30] sm:$0xff] }
  0x81   : > { %3208 = vmatprep.subr.bf16.mxu1 %v4420_v10  ;;  %v4427_v16 = vpack.c.bf16 %v681_v14, %v677_v13  ;;  %v685_v19 = vld [vmem:[#allocation6 + $0xc8] sm:$0xff]  ;;  %v4430_v21 = vpack.c.bf16 %v680_v18, %v676_v17  ;;  %v684_v23 = vld [vmem:[#allocation6 + $0xc0] sm:$0xff]  ;;  %v671_v63 = vld [vmem:[#allocation6 + $0x58] sm:$0xff]  ;;  %v4492_v2 = vpack.c.bf16 %v666_v62, %v662_v61  ;;  %v411_v62 = vlaneseq }
  0x82   : > { %v689_v20 = vld [vmem:[#allocation6 + $0xe8] sm:$0xff]  ;;  %v688_v24 = vld [vmem:[#allocation6 + $0xe0] sm:$0xff]  ;;  %v675_v0 = vld [vmem:[#allocation6 + $0x78] sm:$0xff] }
  0x83   : > { %v4433_v22 = vpack.c.bf16 %v689_v20, %v685_v19  ;;  %v407_v25 = vld [vmem:[%s4985_s1] sm:$0xff]  ;;  %v693_v26 = vld [vmem:[#allocation6 + $0x108] sm:$0xff]  ;;  %v4440_v30 = vpack.c.bf16 %v688_v24, %v684_v23  ;;  %v4496_v3 = vpack.c.bf16 %v675_v0, %v671_v63  ;;  %v670_v5 = vld [vmem:[#allocation6 + $0x50] sm:$0xff]  ;;  %v4582_v63 = vshrl.u32 %v411_v62, 7 }
  0x84   : > { %3210 = vmatpush1.bf16.msra.mxu1 %v4424_v15  ;;  %v697_v27 = vld [vmem:[#allocation6 + $0x128] sm:$0xff]  ;;  %v433_v28 = vcombine.high %v407_v25, %v407_v25  ;;  %v403_v29 = vld [vmem:[%s4405_s15] sm:$0xff]  ;;  %v674_v6 = vld [vmem:[#allocation6 + $0x70] sm:$0xff] }
  0x85   : > { %3212 = vmatprep.subr.bf16.mxu1 %v4427_v16  ;;  %v4444_v31 = vpack.c.bf16 %v697_v27, %v693_v26  ;;  %v692_v32 = vld [vmem:[#allocation6 + $0x100] sm:$0xff]  ;;  %v701_v34 = vld [vmem:[#allocation6 + $0x148] sm:$0xff]  ;;  %v679_v7 = vld [vmem:[#allocation6 + $0x98] sm:$0xff]  ;;  %v4503_v12 = vpack.c.bf16 %v674_v6, %v670_v5  ;;  %v413_v0 = vsub.s32 0, %v4582_v63  ;;  %v4998_v5 = vsub.s32 1, %v4582_v63 }
  0x86   : > { %3106 = vmatprep.subr.msk.mxu0 %vm448_vm0, %v433_v28  ;;  %v696_v33 = vld [vmem:[#allocation6 + $0x120] sm:$0xff]  ;;  %v705_v35 = vld [vmem:[#allocation6 + $0x168] sm:$0xff]  ;;  %v683_v11 = vld [vmem:[#allocation6 + $0xb8] sm:$0xff] }
  0x87   : > { %3107 = vmatpush1.msk.msra.mxu0 %vm448_vm0, %v407_v25  ;;  %v4450_v36 = vpack.c.bf16 %v696_v33, %v692_v32  ;;  %v408_v37 = vld [vmem:[%s4985_s1 + $0x8] sm:$0xff]  ;;  %v4456_v38 = vpack.c.bf16 %v705_v35, %v701_v34  ;;  %v700_v39 = vld [vmem:[#allocation6 + $0x140] sm:$0xff]  ;;  %v4507_v13 = vpack.c.bf16 %v683_v11, %v679_v7  ;;  %v678_v14 = vld [vmem:[#allocation6 + $0x90] sm:$0xff]  ;;  %v4997_v11 = vsub.s32 2, %v4582_v63 }
  0x88   : > { %3214 = vmatpush1.bf16.msra.mxu1 %v4430_v21  ;;  %3108 = vmatmul.mubr.msk.f32.vlgmr.msra.gmra.mrb[0].mxu0 %vm435_vm1, %v403_v29  ;;  %v704_v40 = vld [vmem:[#allocation6 + $0x160] sm:$0xff]  ;;  %v434_v41 = vcombine.high %v408_v37, %v408_v37  ;;  %v709_v42 = vld [vmem:[#allocation6 + $0x188] sm:$0xff]  ;;  %v682_v17 = vld [vmem:[#allocation6 + $0xb0] sm:$0xff] }
  0x89   : > { %3216 = vmatprep.subr.bf16.mxu1 %v4433_v22  ;;  %527 = vmatprep.mubr.f32.mxu0 %v4201_v8  ;;  %v713_v43 = vld [vmem:[#allocation6 + $0x1a8] sm:$0xff]  ;;  %v4462_v45 = vpack.c.bf16 %v704_v40, %v700_v39  ;;  %v708_v48 = vld [vmem:[#allocation6 + $0x180] sm:$0xff]  ;;  %v687_v18 = vld [vmem:[#allocation6 + $0xd8] sm:$0xff]  ;;  %v4514_v20 = vpack.c.bf16 %v682_v17, %v678_v14  ;;  %v4996_v17 = vsub.s32 3, %v4582_v63 }
  0x8a   : > { %v404_v44 = vld [vmem:[%s4405_s15 + $0x8] sm:$0xff]  ;;  %3112 = vmatprep.subr.msk.mxu0 %vm448_vm0, %v434_v41  ;;  %v4467_v47 = vpack.c.bf16 %v713_v43, %v709_v42  ;;  %v712_v49 = vld [vmem:[#allocation6 + $0x1a0] sm:$0xff]  ;;  %v691_v19 = vld [vmem:[#allocation6 + $0xf8] sm:$0xff] }
  0x8b   : > { %3113 = vmatpush1.msk.msra.mxu0 %vm448_vm0, %v408_v37  ;;  %v717_v50 = vld [vmem:[#allocation6 + $0x1c8] sm:$0xff]  ;;  %v4473_v52 = vpack.c.bf16 %v712_v49, %v708_v48  ;;  %v716_v55 = vld [vmem:[#allocation6 + $0x1c0] sm:$0xff]  ;;  %v4518_v23 = vpack.c.bf16 %v691_v19, %v687_v18  ;;  %v686_v24 = vld [vmem:[#allocation6 + $0xd0] sm:$0xff] }
  0x8c   : > { %3218 = vmatpush1.bf16.msra.mxu1 %v4440_v30  ;;  %3109 = vmatmul.mubr.msk.f32.gmra.mrb[2].mxu0 %vm435_vm1, %v404_v44  ;;  %v721_v51 = vld [vmem:[#allocation6 + $0x1e8] sm:$0xff]  ;;  %v720_v56 = vld [vmem:[#allocation6 + $0x1e0] sm:$0xff]  ;;  %v690_v25 = vld [vmem:[#allocation6 + $0xf0] sm:$0xff] }
  0x8d   : > { %3220 = vmatprep.subr.bf16.mxu1 %v4444_v31  ;;  %533 = vmatprep.mubr.f32.mxu0 %v4201_v8  ;;  %v4478_v54 = vpack.c.bf16 %v721_v51, %v717_v50  ;;  %v4482_v59 = vpack.c.bf16 %v720_v56, %v716_v55  ;;  %v4490_v1 = vld [vmem:[#allocation4] sm:$0xff]  ;;  %v695_v26 = vld [vmem:[#allocation6 + $0x118] sm:$0xff]  ;;  %v4524_v28 = vpack.c.bf16 %v690_v25, %v686_v24  ;;  %v694_v32 = vld [vmem:[#allocation6 + $0x110] sm:$0xff] }
  0x8e   : > { %3268 = vmatprep.subr.bf16.mxu0 %v4414_v4  ;;  %v699_v27 = vld [vmem:[#allocation6 + $0x138] sm:$0xff]  ;;  %v698_v33 = vld [vmem:[#allocation6 + $0x130] sm:$0xff] }
  0x8f   : > { %v703_v34 = vld [vmem:[#allocation6 + $0x158] sm:$0xff]  ;;  %v4533_v37 = vpack.c.bf16 %v698_v33, %v694_v32  ;;  %v702_v40 = vld [vmem:[#allocation6 + $0x150] sm:$0xff] }
  0x90   : > { %3222 = vmatpush1.bf16.msra.mxu1 %v4450_v36  ;;  %3110 = vmatmul.mubr.msk.f32.gmra.mrb[4].mxu0 %vm435_vm1, %v405_v46  ;;  %v707_v35 = vld [vmem:[#allocation6 + $0x178] sm:$0xff]  ;;  %v706_v41 = vld [vmem:[#allocation6 + $0x170] sm:$0xff] }
  0x91   : > { %3224 = vmatprep.subr.bf16.mxu1 %v4456_v38  ;;  %539 = vmatprep.mubr.f32.mxu0 %v4201_v8  ;;  %v4536_v39 = vpack.c.bf16 %v707_v35, %v703_v34  ;;  %v711_v42 = vld [vmem:[#allocation6 + $0x198] sm:$0xff]  ;;  %v710_v48 = vld [vmem:[#allocation6 + $0x190] sm:$0xff] }
  0x92   : > { %v715_v43 = vld [vmem:[#allocation6 + $0x1b8] sm:$0xff]  ;;  %v714_v49 = vld [vmem:[#allocation6 + $0x1b0] sm:$0xff] }
  0x93   : > { %v719_v50 = vld [vmem:[#allocation6 + $0x1d8] sm:$0xff]  ;;  %v718_v56 = vld [vmem:[#allocation6 + $0x1d0] sm:$0xff] }
  0x94   : > { %3226 = vmatpush1.bf16.msra.mxu1 %v4462_v45  ;;  %3111 = vmatmul.mubr.msk.f32.gmra.mrb[6].mxu0 %vm435_vm1, %v406_v53  ;;  %v723_v51 = vld [vmem:[#allocation6 + $0x1f8] sm:$0xff]  ;;  %v722_v57 = vld [vmem:[#allocation6 + $0x1f0] sm:$0xff] }
  0x95   : > { %3228 = vmatprep.subr.bf16.mxu1 %v4467_v47  ;;  %610 = vmatprep.mubr.f32.mxu0 %v4201_v8  ;;  %v4552_v55 = vpack.c.bf16 %v723_v51, %v719_v50  ;;  %v4557_v58 = vpack.c.bf16 %v722_v57, %v718_v56 }
  0x98   : > { %3230 = vmatpush1.bf16.msra.mxu1 %v4473_v52  ;;  %3114 = vmatmul.mubr.msk.f32.vlgmr.msra.gmra.mrb[8].mxu0 %vm435_vm1, %v403_v29  ;;  %v4528_v29 = vpack.c.bf16 %v699_v27, %v695_v26 }
  0x99   : > { %3232 = vmatprep.subr.bf16.mxu1 %v4478_v54  ;;  %3270 = vmatpush1.bf16.msra.mxu0 %v4418_v9 }
  0x9a   : > { %3272 = vmatprep.subr.bf16.mxu0 %v4420_v10  ;;  %616 = vmatprep.mubr.f32.mxu0 %v4201_v8 }
  0x9c   : > { %3234 = vmatpush1.bf16.msra.mxu1 %v4482_v59  ;;  %3115 = vmatmul.mubr.msk.f32.gmra.mrb[10].mxu0 %vm435_vm1, %v404_v44  ;;  %v4541_v44 = vpack.c.bf16 %v706_v41, %v702_v40 }
  0x9d   : > { %3236 = vmatprep.subr.bf16.mxu1 %v4486_v60  ;;  %3274 = vmatpush1.bf16.msra.mxu0 %v4424_v15 }
  0x9e   : > { %3276 = vmatprep.subr.bf16.mxu0 %v4427_v16  ;;  %622 = vmatprep.mubr.f32.mxu0 %v4201_v8 }
  0x9f   : > { %789 = vmatmul.mubr.f32.vlgmr.msra.gmra.mrb[0].mxu1 %v4490_v1 }
  0xa0   : > { %3238 = vmatpush1.bf16.msra.mxu1 %v4492_v2  ;;  %859 = vmatprep.mubr.f32.mxu1 %v4201_v8 }
  0xa1   : > { %3240 = vmatprep.subr.bf16.mxu1 %v4496_v3  ;;  %3116 = vmatmul.mubr.msk.f32.gmra.mrb[12].mxu0 %vm435_vm1, %v405_v46  ;;  %v4544_v46 = vpack.c.bf16 %v715_v43, %v711_v42 }
  0xa2   : > { %628 = vmatprep.mubr.f32.mxu0 %v4201_v8  ;;  %3278 = vmatpush1.bf16.msra.mxu0 %v4430_v21 }
  0xa3   : > { %3280 = vmatprep.subr.bf16.mxu0 %v4433_v22 }
  0xa4   : > { %3242 = vmatpush1.bf16.msra.mxu1 %v4503_v12 }
  0xa5   : > { %3244 = vmatprep.subr.bf16.mxu1 %v4507_v13  ;;  %3117 = vmatmul.mubr.msk.f32.gmra.mrb[14].mxu0 %vm435_vm1, %v406_v53  ;;  %v4549_v53 = vpack.c.bf16 %v714_v49, %v710_v48 }
  0xa6   : > { %1030 = vmatprep.mubr.f32.mxu0 %v4201_v8  ;;  %3282 = vmatpush1.bf16.msra.mxu0 %v4440_v30 }
  0xa7   : > { %3284 = vmatprep.subr.bf16.mxu0 %v4444_v31 }
  0xa8   : > { %3246 = vmatpush1.bf16.msra.mxu1 %v4514_v20 }
  0xa9   : > { %3248 = vmatprep.subr.bf16.mxu1 %v4518_v23 }
  0xaa   : > { %3286 = vmatpush1.bf16.msra.mxu0 %v4450_v36 }
  0xab   : > { %3288 = vmatprep.subr.bf16.mxu0 %v4456_v38 }
  0xac   : > { %3250 = vmatpush1.bf16.msra.mxu1 %v4524_v28 }
  0xad   : > { %3252 = vmatprep.subr.bf16.mxu1 %v4528_v29 }
  0xae   : > { %3290 = vmatpush1.bf16.msra.mxu0 %v4462_v45 }
  0xaf   : > { %3292 = vmatprep.subr.bf16.mxu0 %v4467_v47 }
  0xb0   : > { %3254 = vmatpush1.bf16.msra.mxu1 %v4533_v37 }
  0xb1   : > { %3256 = vmatprep.subr.bf16.mxu1 %v4536_v39 }
  0xb2   : > { %3294 = vmatpush1.bf16.msra.mxu0 %v4473_v52 }
  0xb3   : > { %3296 = vmatprep.subr.bf16.mxu0 %v4478_v54 }
  0xb4   : > { %3258 = vmatpush1.bf16.msra.mxu1 %v4541_v44 }
  0xb5   : > { %3260 = vmatprep.subr.bf16.mxu1 %v4544_v46 }
  0xb6   : > { %3298 = vmatpush1.bf16.msra.mxu0 %v4482_v59 }
  0xb7   : > { %3332 = vmatprep.subr.bf16.mxu0 %v4414_v4 }
  0xb8   : > { %3262 = vmatpush1.bf16.msra.mxu1 %v4549_v53 }
  0xb9   : > { %3264 = vmatprep.subr.bf16.mxu1 %v4552_v55 }
  0xbc   : > { %3266 = vmatpush1.bf16.msra.mxu1 %v4557_v58 }
  0xbd   : > { %3300 = vmatprep.subr.bf16.mxu1 %v4486_v60 }
  0xbf   : > { %860 = vmatmul.mubr.f32.vlgmr.msra.gmra.mrb[2].mxu1 %v4490_v1  ;;  %v409_v1 = vld [vmem:[%s4987_s3] sm:$0xf] }
  0xc0   : > { %3302 = vmatpush1.bf16.msra.mxu1 %v4492_v2  ;;  %1101 = vmatprep.mubr.f32.mxu1 %v4201_v8  ;;  %v4591_v6 = vrot.slane %v409_v1, %v413_v0  ;;  %v4595_v7 = vrot.slane %v409_v1, %v4998_v5  ;;  %v422_v25 = vrot.slane %v409_v1, %v4997_v11 }
  0xc1   : > { %3304 = vmatprep.subr.bf16.mxu1 %v4496_v3  ;;  %v426_v27 = vrot.slane %v409_v1, %v4996_v17 }
  0xc4   : > { %3306 = vmatpush1.bf16.msra.mxu1 %v4503_v12 }
  0xc5   : > { %3308 = vmatprep.subr.bf16.mxu1 %v4507_v13 }
  0xc8   : > { %3310 = vmatpush1.bf16.msra.mxu1 %v4514_v20 }
  0xc9   : > { %3312 = vmatprep.subr.bf16.mxu1 %v4518_v23 }
  0xcc   : > { %3314 = vmatpush1.bf16.msra.mxu1 %v4524_v28 }
  0xcd   : > { %3316 = vmatprep.subr.bf16.mxu1 %v4528_v29 }
  0xd0   : > { %3318 = vmatpush1.bf16.msra.mxu1 %v4533_v37 }
  0xd1   : > { %3320 = vmatprep.subr.bf16.mxu1 %v4536_v39 }
  0xd4   : > { %3322 = vmatpush1.bf16.msra.mxu1 %v4541_v44 }
  0xd5   : > { %3324 = vmatprep.subr.bf16.mxu1 %v4544_v46 }
  0xd8   : > { %3326 = vmatpush1.bf16.msra.mxu1 %v4549_v53 }
  0xd9   : > { %3328 = vmatprep.subr.bf16.mxu1 %v4552_v55 }
  0xdc   : > { %3330 = vmatpush1.bf16.msra.mxu1 %v4557_v58 }
  0xdd   : > { %3364 = vmatprep.subr.bf16.mxu1 %v4486_v60 }
 0x15b   : > { %v523_v4 = vpop.f32.mrb[0].mxu0 }
 0x15c   : > { %v525_v61 = vpop.f32.mrb[1].mxu0  ;;  %v524_v18 = vadd.f32 %v523_v4, %v4591_v6 }
 0x15d   : > { %v526_v24 = vadd.f32 %v525_v61, %v4595_v7 }
 0x16b   : > { %v612_v14 = vpop.f32.mrb[8].mxu0 }
 0x16c   : > { %v614_v19 = vpop.f32.mrb[9].mxu0 }
 0x16f   : > { %v618_v32 = vpop.f32.mrb[10].mxu0 }
 0x170   : > { %v4605_v35 = vadd.f32 %v618_v32, %v422_v25  ;;  %v620_v40 = vpop.f32.mrb[11].mxu0  ;;  %v615_v32 = vadd.f32 %v614_v19, %v426_v27 }
 0x171   : > { %v4607_v42 = vadd.f32 %v620_v40, %v426_v27 }
 0x172   : > { %v790_v26 = vpop.f32.mrb[0].mxu1 }
 0x173   : > { %v866_v33 = vadd.f32 %v790_v26, %v524_v18  ;;  %v792_v34 = vpop.f32.mrb[1].mxu1 }
 0x174   : > { %v867_v41 = vadd.f32 %v792_v34, %v526_v24  ;;  %v624_v43 = vpop.f32.mrb[12].mxu0  ;;  %v613_v24 = vadd.f32 %v612_v14, %v422_v25 }
 0x175   : > { %v4609_v48 = vadd.f32 %v624_v43, %v422_v25  ;;  %v626_v49 = vpop.f32.mrb[13].mxu0  ;;  %v3118_v62 = vmul.f32 -1.442695, %v866_v33 }
 0x176   : > { %v4611_v50 = vadd.f32 %v626_v49, %v426_v27  ;;  %v3119_v61 = vmul.f32 -1.442695, %v867_v41  ;;  %v652_v41 = vld [vmem:[#allocation5] sm:$0xff] }
 0x178   : > { %v630_v51 = vpop.f32.mrb[14].mxu0  ;;  %3932 = vpow2.f32 %v3119_v61 }
 0x179   : > { %v4613_v56 = vadd.f32 %v630_v51, %v422_v25  ;;  %v632_v57 = vpop.f32.mrb[15].mxu0  ;;  %3934 = vpow2.f32 %v3118_v62 }
 0x17a   : > { %v4615_v4 = vadd.f32 %v632_v57, %v426_v27 }
 0x182   : > { %v3933_v1 = vpop.eup %3932 }
 0x183   : > { %v3935_v18 = vpop.eup %3934  ;;  %v880_v26 = vadd.f32 1.0, %v3933_v1 }
 0x184   : > { %v879_v34 = vadd.f32 1.0, %v3935_v18 }
 0x185   : > { %3936 = vrcp.f32 %v880_v26 }
 0x186   : > { %3938 = vrcp.f32 %v879_v34 }
 0x18f   : > { %v3937_v57 = vpop.eup %3936 }
 0x190   : > { %v3939_v33 = vpop.eup %3938  ;;  %v889_v11 = vmul.f32 %v3937_v57, %v652_v41  ;;  %v1417_v57 = vld [vmem:[#allocation6 + $0xe8] sm:$0xff] }
 0x192   : > { %v861_v40 = vpop.f32.mrb[2].mxu1 }
 0x193   : > { %v868_v43 = vadd.f32 %v861_v40, %v613_v24  ;;  %v863_v49 = vpop.f32.mrb[3].mxu1 }
 0x194   : > { %v869_v17 = vadd.f32 %v863_v49, %v615_v32 }
 0x195   : > { %v3120_v51 = vmul.f32 -1.442695, %v868_v43  ;;  %v1408_v43 = vld [vmem:[#allocation6 + $0xa0] sm:$0xff] }
 0x196   : > { %3940 = vtanh.f32 %v869_v17 }
 0x197   : > { %3942 = vpow2.f32 %v3120_v51  ;;  %v1413_v51 = vld [vmem:[#allocation6 + $0xc8] sm:$0xff] }
 0x198   : > { %v3407_v41 = vpack.c.bf16 %v1417_v57, %v1413_v51 }
 0x1a0   : > { %v3941_v61 = vpop.eup %3940 }
 0x1a1   : > { %v3943_v62 = vpop.eup %3942  ;;  %v890_v5 = vmul.f32 %v3941_v61, %v3939_v33  ;;  %v1412_v33 = vld [vmem:[#allocation6 + $0xc0] sm:$0xff] }
 0x1a2   : > { %v881_v14 = vadd.f32 1.0, %v3943_v62  ;;  %v1416_v61 = vld [vmem:[#allocation6 + $0xe0] sm:$0xff] }
 0x1a3   : > { %v4617_v25 = vadd.f32 %v890_v5, %v889_v11  ;;  %v3409_v62 = vpack.c.bf16 %v1416_v61, %v1412_v33 }
 0x1a4   : > { %3944 = vrcp.f32 %v881_v14  ;;  %v1421_v14 = vld [vmem:[#allocation6 + $0x108] sm:$0xff] }
 0x1a5   : > { %3946 = vtanh.f32 %v4617_v25 }
 0x1ae   : > { %v3945_v19 = vpop.eup %3944 }
 0x1af   : > { %v3947_v27 = vpop.eup %3946 }
 0x1b0   : > { %v4620_v1 = vmul.f32 %v3947_v27, %v3945_v19  ;;  %v1420_v27 = vld [vmem:[#allocation6 + $0x100] sm:$0xff] }
 0x1b2   : > { %1031 = vmatmul.mubr.f32.vlgmr.msra.gmra.mrb[2].mxu0 %v4620_v1  ;;  %1102 = vmatmul.mubr.f32.vlgmr.msra.gmra.mrb[4].mxu1 %v4620_v1 }
 0x1b3   : > { %3334 = vmatpush1.bf16.msra.mxu0 %v4418_v9  ;;  %3366 = vmatpush1.bf16.msra.mxu1 %v4492_v2 }
 0x1b4   : > { %3336 = vmatprep.subr.bf16.mxu0 %v4420_v10  ;;  %3368 = vmatprep.subr.bf16.mxu1 %v4496_v3 }
 0x1b5   : > { %1273 = vmatprep.mubr.f32.mxu0 %v4201_v8  ;;  %1344 = vmatprep.mubr.f32.mxu1 %v4201_v8 }
 0x1b7   : > { %3338 = vmatpush1.bf16.msra.mxu0 %v4424_v15  ;;  %3370 = vmatpush1.bf16.msra.mxu1 %v4503_v12 }
 0x1b8   : > { %3340 = vmatprep.subr.bf16.mxu0 %v4427_v16  ;;  %3372 = vmatprep.subr.bf16.mxu1 %v4507_v13 }
 0x1bb   : > { %3342 = vmatpush1.bf16.msra.mxu0 %v4430_v21  ;;  %3374 = vmatpush1.bf16.msra.mxu1 %v4514_v20 }
 0x1bc   : > { %3344 = vmatprep.subr.bf16.mxu0 %v4433_v22  ;;  %3376 = vmatprep.subr.bf16.mxu1 %v4518_v23 }
 0x1bf   : > { %3346 = vmatpush1.bf16.msra.mxu0 %v4440_v30  ;;  %3378 = vmatpush1.bf16.msra.mxu1 %v4524_v28 }
 0x1c0   : > { %3348 = vmatprep.subr.bf16.mxu0 %v4444_v31  ;;  %3380 = vmatprep.subr.bf16.mxu1 %v4528_v29 }
 0x1c3   : > { %3350 = vmatpush1.bf16.msra.mxu0 %v4450_v36  ;;  %3382 = vmatpush1.bf16.msra.mxu1 %v4533_v37 }
 0x1c4   : > { %3352 = vmatprep.subr.bf16.mxu0 %v4456_v38  ;;  %3384 = vmatprep.subr.bf16.mxu1 %v4536_v39 }
 0x1c7   : > { %3354 = vmatpush1.bf16.msra.mxu0 %v4462_v45  ;;  %3386 = vmatpush1.bf16.msra.mxu1 %v4541_v44 }
 0x1c8   : > { %3356 = vmatprep.subr.bf16.mxu0 %v4467_v47  ;;  %3388 = vmatprep.subr.bf16.mxu1 %v4544_v46 }
 0x1cb   : > { %3358 = vmatpush1.bf16.msra.mxu0 %v4473_v52  ;;  %3390 = vmatpush1.bf16.msra.mxu1 %v4549_v53 }
 0x1cc   : > { %3360 = vmatprep.subr.bf16.mxu0 %v4478_v54  ;;  %3392 = vmatprep.subr.bf16.mxu1 %v4552_v55 }
 0x1cf   : > { %3362 = vmatpush1.bf16.msra.mxu0 %v4482_v59  ;;  %3394 = vmatpush1.bf16.msra.mxu1 %v4557_v58 }
 0x1d0   : > { %3428 = vmatprep.subr.bf16.mxu1 %v4486_v60 }
 0x285   : > { %v1032_v9 = vpop.f32.mrb[2].mxu0  ;;  %v1103_v10 = vpop.f32.mrb[4].mxu1 }
 0x286   : > { %v3815_v15 = vadd.f32 %v1032_v9, %v4591_v6  ;;  %v1110_v16 = vadd.f32 %v1103_v10, %v4605_v35  ;;  %v1034_v21 = vpop.f32.mrb[3].mxu0  ;;  %v1105_v22 = vpop.f32.mrb[5].mxu1  ;;  %v1424_v9 = vld [vmem:[#allocation6 + $0x120] sm:$0xff] }
 0x287   : > { %v3816_v30 = vadd.f32 %v1034_v21, %v4595_v7  ;;  %v1111_v31 = vadd.f32 %v1105_v22, %v4607_v42  ;;  %v3413_v10 = vpack.c.bf16 %v1424_v9, %v1420_v27  ;;  %v1428_v22 = vld [vmem:[#allocation6 + $0x140] sm:$0xff]  ;;  %v1639_v27 = vld [vmem:[#allocation8 + $0x48] sm:$0xff] }
 0x288   : > { %v3121_v36 = vmul.f32 -1.442695, %v3815_v15  ;;  %v3123_v45 = vmul.f32 -1.442695, %v1110_v16  ;;  %v1429_v15 = vld [vmem:[#allocation6 + $0x148] sm:$0xff] }
 0x289   : > { %v3122_v38 = vmul.f32 -1.442695, %v3816_v30  ;;  %v1433_v16 = vld [vmem:[#allocation6 + $0x168] sm:$0xff]  ;;  %v1432_v30 = vld [vmem:[#allocation6 + $0x160] sm:$0xff] }
 0x28a   : > { %3948 = vpow2.f32 %v3121_v36  ;;  %v3415_v21 = vpack.c.bf16 %v1433_v16, %v1429_v15  ;;  %v1437_v36 = vld [vmem:[#allocation6 + $0x188] sm:$0xff]  ;;  %v1645_v15 = vld [vmem:[#allocation8 + $0x78] sm:$0xff] }
 0x28b   : > { %3950 = vpow2.f32 %v3122_v38  ;;  %v1441_v38 = vld [vmem:[#allocation6 + $0x1a8] sm:$0xff] }
 0x28c   : > { %3952 = vtanh.f32 %v1111_v31  ;;  %v3417_v31 = vpack.c.bf16 %v1432_v30, %v1428_v22  ;;  %v1643_v9 = vld [vmem:[#allocation8 + $0x68] sm:$0xff] }
 0x28d   : > { %3954 = vpow2.f32 %v3123_v45  ;;  %v1436_v45 = vld [vmem:[#allocation6 + $0x180] sm:$0xff] }
 0x294   : > { %v3949_v47 = vpop.eup %3948 }
 0x295   : > { %v1121_v52 = vadd.f32 1.0, %v3949_v47  ;;  %v3951_v54 = vpop.eup %3950  ;;  %v3419_v47 = vpack.c.bf16 %v1441_v38, %v1437_v36  ;;  %v1642_v36 = vld [vmem:[#allocation8 + $0x60] sm:$0xff]  ;;  %v3463_v38 = vpack.c.bf16 %v1643_v9, %v1639_v27  ;;  %v1677_v27 = vld [vmem:[#allocation8 + $0x178] sm:$0xff] }
 0x296   : > { %v1122_v59 = vadd.f32 1.0, %v3951_v54  ;;  %v3953_v60 = vpop.eup %3952  ;;  %v1445_v54 = vld [vmem:[#allocation6 + $0x1c8] sm:$0xff] }
 0x297   : > { %3956 = vrcp.f32 %v1121_v52  ;;  %v3955_v5 = vpop.eup %3954  ;;  %v1440_v52 = vld [vmem:[#allocation6 + $0x1a0] sm:$0xff] }
 0x298   : > { %3958 = vrcp.f32 %v1122_v59  ;;  %v1123_v18 = vadd.f32 1.0, %v3955_v5  ;;  %v1449_v59 = vld [vmem:[#allocation6 + $0x1e8] sm:$0xff] }
 0x299   : > { %v3423_v5 = vpack.c.bf16 %v1449_v59, %v1445_v54  ;;  %v1647_v54 = vld [vmem:[#allocation8 + $0x88] sm:$0xff] }
 0x29a   : > { %3960 = vrcp.f32 %v1123_v18  ;;  %v1635_v18 = vld [vmem:[#allocation8 + $0x28] sm:$0xff] }
 0x29b   : > { %v1651_v59 = vld [vmem:[#allocation8 + $0xa8] sm:$0xff] }
 0x2a1   : > { %v3957_v11 = vpop.eup %3956 }
 0x2a2   : > { %v1132_v17 = vmul.f32 %v3957_v11, %v3953_v60  ;;  %v3959_v35 = vpop.eup %3958  ;;  %v3421_v60 = vpack.c.bf16 %v1440_v52, %v1436_v45  ;;  %v1444_v11 = vld [vmem:[#allocation6 + $0x1c0] sm:$0xff]  ;;  %v1644_v52 = vld [vmem:[#allocation8 + $0x70] sm:$0xff] }
 0x2a3   : > { %v1131_v42 = vmul.f32 %v3959_v35, %v4617_v25  ;;  %v1425_v25 = vld [vmem:[#allocation6 + $0x128] sm:$0xff] }
 0x2a4   : > { %v3961_v26 = vpop.eup %3960  ;;  %v3411_v19 = vpack.c.bf16 %v1425_v25, %v1421_v14  ;;  %v1631_v35 = vld [vmem:[#allocation8 + $0x8] sm:$0xff]  ;;  %v1634_v14 = vld [vmem:[#allocation8 + $0x20] sm:$0xff]  ;;  %v1632_v25 = vld [vmem:[#allocation8 + $0x10] sm:$0xff] }
 0x2a5   : > { %v4662_v24 = vadd.f32 %v1132_v17, %v1131_v42  ;;  %v1448_v17 = vld [vmem:[#allocation6 + $0x1e0] sm:$0xff]  ;;  %v1633_v42 = vld [vmem:[#allocation8 + $0x18] sm:$0xff] }
 0x2a7   : > { %3962 = vtanh.f32 %v4662_v24 }
 0x2b1   : > { %v3963_v32 = vpop.eup %3962 }
 0x2b2   : > { %v4665_v34 = vmul.f32 %v3963_v32, %v3961_v26  ;;  %v1637_v26 = vld [vmem:[#allocation8 + $0x38] sm:$0xff] }
 0x2b3   : > { %v3491_v32 = vpack.c.bf16 %v1637_v26, %v1633_v42  ;;  %v3467_v42 = vpack.c.bf16 %v1651_v59, %v1647_v54  ;;  %v1678_v59 = vld [vmem:[#allocation8 + $0x180] sm:$0xff] }
 0x2b4   : > { %1274 = vmatmul.mubr.f32.vlgmr.msra.gmra.mrb[4].mxu0 %v4665_v34  ;;  %1345 = vmatmul.mubr.f32.vlgmr.msra.gmra.mrb[6].mxu1 %v4665_v34 }
 0x2b5   : > { %3430 = vmatpush1.bf16.msra.mxu1 %v4492_v2  ;;  %1516 = vmatprep.mubr.f32.mxu0 %v4201_v8  ;;  %v1389_v2 = vld [vmem:[#allocation6 + $0x8] sm:$0xff] }
 0x2b6   : > { %3432 = vmatprep.subr.bf16.mxu1 %v4496_v3  ;;  %1587 = vmatprep.mubr.f32.mxu1 %v4201_v8  ;;  %v1393_v3 = vld [vmem:[#allocation6 + $0x28] sm:$0xff] }
 0x2b9   : > { %3434 = vmatpush1.bf16.msra.mxu1 %v4503_v12  ;;  %v3395_v12 = vpack.c.bf16 %v1393_v3, %v1389_v2  ;;  %v3425_v2 = vpack.c.bf16 %v1448_v17, %v1444_v11  ;;  %v3459_v3 = vpack.c.bf16 %v1635_v18, %v1631_v35  ;;  %v1646_v35 = vld [vmem:[#allocation8 + $0x80] sm:$0xff] }
 0x2ba   : > { %3436 = vmatprep.subr.bf16.mxu1 %v4507_v13  ;;  %v1388_v13 = vld [vmem:[#allocation6] sm:$0xff] }
 0x2bb   : > { %3396 = vmatprep.subr.bf16.mxu0 %v3395_v12  ;;  %v1650_v18 = vld [vmem:[#allocation8 + $0xa0] sm:$0xff] }
 0x2bd   : > { %3438 = vmatpush1.bf16.msra.mxu1 %v4514_v20  ;;  %v1392_v20 = vld [vmem:[#allocation6 + $0x20] sm:$0xff] }
 0x2be   : > { %3440 = vmatprep.subr.bf16.mxu1 %v4518_v23  ;;  %v3397_v23 = vpack.c.bf16 %v1392_v20, %v1388_v13 }
 0x2c0   : > { %3398 = vmatpush1.bf16.msra.mxu0 %v3397_v23 }
 0x2c1   : > { %3442 = vmatpush1.bf16.msra.mxu1 %v4524_v28  ;;  %v1397_v28 = vld [vmem:[#allocation6 + $0x48] sm:$0xff] }
 0x2c2   : > { %3444 = vmatprep.subr.bf16.mxu1 %v4528_v29  ;;  %v1401_v29 = vld [vmem:[#allocation6 + $0x68] sm:$0xff] }
 0x2c5   : > { %3446 = vmatpush1.bf16.msra.mxu1 %v4533_v37  ;;  %v3399_v37 = vpack.c.bf16 %v1401_v29, %v1397_v28 }
 0x2c6   : > { %3448 = vmatprep.subr.bf16.mxu1 %v4536_v39  ;;  %v1396_v39 = vld [vmem:[#allocation6 + $0x40] sm:$0xff] }
 0x2c7   : > { %3400 = vmatprep.subr.bf16.mxu0 %v3399_v37 }
 0x2c9   : > { %3450 = vmatpush1.bf16.msra.mxu1 %v4541_v44  ;;  %v1400_v44 = vld [vmem:[#allocation6 + $0x60] sm:$0xff] }
 0x2ca   : > { %3452 = vmatprep.subr.bf16.mxu1 %v4544_v46  ;;  %v3401_v46 = vpack.c.bf16 %v1400_v44, %v1396_v39 }
 0x2cc   : > { %3402 = vmatpush1.bf16.msra.mxu0 %v3401_v46 }
 0x2cd   : > { %3454 = vmatpush1.bf16.msra.mxu1 %v4549_v53  ;;  %v1405_v53 = vld [vmem:[#allocation6 + $0x88] sm:$0xff] }
 0x2ce   : > { %3456 = vmatprep.subr.bf16.mxu1 %v4552_v55  ;;  %v1409_v55 = vld [vmem:[#allocation6 + $0xa8] sm:$0xff] }
 0x2cf   : > { %v3403_v40 = vpack.c.bf16 %v1409_v55, %v1405_v53 }
 0x2d1   : > { %3458 = vmatpush1.bf16.msra.mxu1 %v4557_v58  ;;  %v1404_v58 = vld [vmem:[#allocation6 + $0x80] sm:$0xff]  ;;  %3404 = vmatprep.subr.bf16.mxu0 %v3403_v40 }
 0x2d2   : > { %v3405_v49 = vpack.c.bf16 %v1408_v43, %v1404_v58  ;;  %3492 = vmatprep.subr.bf16.mxu1 %v3491_v32  ;;  %v1648_v32 = vld [vmem:[#allocation8 + $0x90] sm:$0xff] }
 0x2d4   : > { %3406 = vmatpush1.bf16.msra.mxu0 %v3405_v49 }
 0x2d5   : > { %3408 = vmatprep.subr.bf16.mxu0 %v3407_v41 }
 0x2d8   : > { %3410 = vmatpush1.bf16.msra.mxu0 %v3409_v62  ;;  %v1630_v62 = vld [vmem:[#allocation8] sm:$0xff] }
 0x2d9   : > { %3412 = vmatprep.subr.bf16.mxu0 %v3411_v19  ;;  %v1636_v19 = vld [vmem:[#allocation8 + $0x30] sm:$0xff]  ;;  %v3461_v22 = vpack.c.bf16 %v1634_v14, %v1630_v62  ;;  %v1671_v14 = vld [vmem:[#allocation8 + $0x148] sm:$0xff] }
 0x2da   : > { %v3493_v30 = vpack.c.bf16 %v1636_v19, %v1632_v25  ;;  %v1668_v62 = vld [vmem:[#allocation8 + $0x130] sm:$0xff]  ;;  %v1675_v25 = vld [vmem:[#allocation8 + $0x168] sm:$0xff]  ;;  %v1673_v19 = vld [vmem:[#allocation8 + $0x158] sm:$0xff] }
 0x2dc   : > { %3414 = vmatpush1.bf16.msra.mxu0 %v3413_v10  ;;  %v1641_v10 = vld [vmem:[#allocation8 + $0x58] sm:$0xff] }
 0x2dd   : > { %3416 = vmatprep.subr.bf16.mxu0 %v3415_v21  ;;  %v3495_v45 = vpack.c.bf16 %v1645_v15, %v1641_v10  ;;  %v1670_v15 = vld [vmem:[#allocation8 + $0x140] sm:$0xff] }
 0x2e0   : > { %3418 = vmatpush1.bf16.msra.mxu0 %v3417_v31  ;;  %v1638_v31 = vld [vmem:[#allocation8 + $0x40] sm:$0xff] }
 0x2e1   : > { %3420 = vmatprep.subr.bf16.mxu0 %v3419_v47  ;;  %v1640_v47 = vld [vmem:[#allocation8 + $0x50] sm:$0xff]  ;;  %v3465_v11 = vpack.c.bf16 %v1642_v36, %v1638_v31  ;;  %v1679_v36 = vld [vmem:[#allocation8 + $0x188] sm:$0xff] }
 0x2e2   : > { %v3497_v17 = vpack.c.bf16 %v1644_v52, %v1640_v47  ;;  %v1676_v31 = vld [vmem:[#allocation8 + $0x170] sm:$0xff]  ;;  %v1685_v47 = vld [vmem:[#allocation8 + $0x1b8] sm:$0xff] }
 0x2e4   : > { %3422 = vmatpush1.bf16.msra.mxu0 %v3421_v60  ;;  %v1649_v60 = vld [vmem:[#allocation8 + $0x98] sm:$0xff] }
 0x2e5   : > { %3424 = vmatprep.subr.bf16.mxu0 %v3423_v5  ;;  %v1653_v5 = vld [vmem:[#allocation8 + $0xb8] sm:$0xff] }
 0x2e6   : > { %v3499_v26 = vpack.c.bf16 %v1653_v5, %v1649_v60  ;;  %v1682_v60 = vld [vmem:[#allocation8 + $0x1a0] sm:$0xff] }
 0x2e8   : > { %3426 = vmatpush1.bf16.msra.mxu0 %v3425_v2  ;;  %v1652_v2 = vld [vmem:[#allocation8 + $0xb0] sm:$0xff] }
 0x2e9   : > { %3460 = vmatprep.subr.bf16.mxu0 %v3459_v3  ;;  %v1655_v3 = vld [vmem:[#allocation8 + $0xc8] sm:$0xff] }
 0x387   : > { %v1275_v12 = vpop.f32.mrb[4].mxu0  ;;  %v1346_v13 = vpop.f32.mrb[6].mxu1 }
 0x388   : > { %v3817_v20 = vadd.f32 %v1275_v12, %v4591_v6  ;;  %v1353_v23 = vadd.f32 %v1346_v13, %v4609_v48  ;;  %v1277_v28 = vpop.f32.mrb[5].mxu0  ;;  %v1348_v29 = vpop.f32.mrb[7].mxu1  ;;  %v1659_v12 = vld [vmem:[#allocation8 + $0xe8] sm:$0xff]  ;;  %v1657_v13 = vld [vmem:[#allocation8 + $0xd8] sm:$0xff] }
 0x389   : > { %v3818_v37 = vadd.f32 %v1277_v28, %v4595_v7  ;;  %v1354_v39 = vadd.f32 %v1348_v29, %v4611_v50  ;;  %v3501_v28 = vpack.c.bf16 %v1652_v2, %v1648_v32  ;;  %v1654_v29 = vld [vmem:[#allocation8 + $0xc0] sm:$0xff]  ;;  %v1693_v32 = vld [vmem:[#allocation8 + $0x1f8] sm:$0xff]  ;;  %v3485_v2 = vpack.c.bf16 %v1682_v60, %v1678_v59  ;;  %v1943_v59 = vld [vmem:[#allocation10 + $0xc8] sm:$0xff] }
 0x38a   : > { %v3124_v44 = vmul.f32 -1.442695, %v3817_v20  ;;  %v3126_v53 = vmul.f32 -1.442695, %v1353_v23  ;;  %v1661_v20 = vld [vmem:[#allocation8 + $0xf8] sm:$0xff]  ;;  %v3469_v23 = vpack.c.bf16 %v1650_v18, %v1646_v35  ;;  %v1684_v35 = vld [vmem:[#allocation8 + $0x1b0] sm:$0xff] }
 0x38b   : > { %v3125_v46 = vmul.f32 -1.442695, %v3818_v37  ;;  %v1658_v37 = vld [vmem:[#allocation8 + $0xe0] sm:$0xff]  ;;  %v1687_v18 = vld [vmem:[#allocation8 + $0x1c8] sm:$0xff] }
 0x38c   : > { %3964 = vpow2.f32 %v3124_v44  ;;  %v3503_v44 = vpack.c.bf16 %v1661_v20, %v1657_v13  ;;  %v1947_v60 = vld [vmem:[#allocation10 + $0xe8] sm:$0xff] }
 0x38d   : > { %3966 = vpow2.f32 %v3125_v46  ;;  %v1656_v46 = vld [vmem:[#allocation8 + $0xd0] sm:$0xff] }
 0x38e   : > { %3968 = vtanh.f32 %v1354_v39  ;;  %v3471_v39 = vpack.c.bf16 %v1659_v12, %v1655_v3  ;;  %v1686_v12 = vld [vmem:[#allocation8 + $0x1c0] sm:$0xff] }
 0x38f   : > { %3970 = vpow2.f32 %v3126_v53  ;;  %v1660_v53 = vld [vmem:[#allocation8 + $0xf0] sm:$0xff] }
 0x396   : > { %v3965_v55 = vpop.eup %3964 }
 0x397   : > { %v1364_v40 = vadd.f32 1.0, %v3965_v55  ;;  %v3967_v58 = vpop.eup %3966  ;;  %v1663_v55 = vld [vmem:[#allocation8 + $0x108] sm:$0xff] }
 0x398   : > { %v1365_v43 = vadd.f32 1.0, %v3967_v58  ;;  %v3969_v48 = vpop.eup %3968  ;;  %v1665_v58 = vld [vmem:[#allocation8 + $0x118] sm:$0xff] }
 0x399   : > { %3972 = vrcp.f32 %v1364_v40  ;;  %v3971_v49 = vpop.eup %3970  ;;  %v1667_v40 = vld [vmem:[#allocation8 + $0x128] sm:$0xff] }
 0x39a   : > { %3974 = vrcp.f32 %v1365_v43  ;;  %v1366_v33 = vadd.f32 1.0, %v3971_v49  ;;  %v1669_v43 = vld [vmem:[#allocation8 + $0x138] sm:$0xff]  ;;  %v3505_v49 = vpack.c.bf16 %v1660_v53, %v1656_v46 }
 0x39b   : > { %v1921_v46 = vld [vmem:[#allocation10 + $0x18] sm:$0xff] }
 0x39c   : > { %3976 = vrcp.f32 %v1366_v33  ;;  %v3507_v33 = vpack.c.bf16 %v1669_v43, %v1665_v58 }
 0x3a3   : > { %v3973_v51 = vpop.eup %3972 }
 0x3a4   : > { %v1375_v57 = vmul.f32 %v3973_v51, %v3969_v48  ;;  %v3975_v41 = vpop.eup %3974  ;;  %v3473_v48 = vpack.c.bf16 %v1658_v37, %v1654_v29  ;;  %v1662_v51 = vld [vmem:[#allocation8 + $0x100] sm:$0xff]  ;;  %v1692_v29 = vld [vmem:[#allocation8 + $0x1f0] sm:$0xff] }
 0x3a5   : > { %v1374_v50 = vmul.f32 %v3975_v41, %v4662_v24  ;;  %v3475_v41 = vpack.c.bf16 %v1667_v40, %v1663_v55  ;;  %v1925_v55 = vld [vmem:[#allocation10 + $0x38] sm:$0xff]  ;;  %v1918_v40 = vld [vmem:[#allocation10] sm:$0xff] }
 0x3a6   : > { %v3977_v16 = vpop.eup %3976  ;;  %v4714_v58 = vpack.c.bf16 %v1925_v55, %v1921_v46  ;;  %v1956_v46 = vld [vmem:[#allocation10 + $0x130] sm:$0xff]  ;;  %v1959_v55 = vld [vmem:[#allocation10 + $0x148] sm:$0xff] }
 0x3a7   : > { %v4691_v61 = vadd.f32 %v1375_v57, %v1374_v50  ;;  %v1666_v57 = vld [vmem:[#allocation8 + $0x120] sm:$0xff]  ;;  %v1664_v50 = vld [vmem:[#allocation8 + $0x110] sm:$0xff] }
 0x3a8   : > { %v3477_v9 = vpack.c.bf16 %v1666_v57, %v1662_v51  ;;  %v3509_v10 = vpack.c.bf16 %v1668_v62, %v1664_v50  ;;  %v1927_v51 = vld [vmem:[#allocation10 + $0x48] sm:$0xff]  ;;  %v1933_v50 = vld [vmem:[#allocation10 + $0x78] sm:$0xff]  ;;  %v1926_v62 = vld [vmem:[#allocation10 + $0x40] sm:$0xff] }
 0x3a9   : > { %3978 = vtanh.f32 %v4691_v61  ;;  %v1931_v57 = vld [vmem:[#allocation10 + $0x68] sm:$0xff] }
 0x3b3   : > { %v3979_v21 = vpop.eup %3978 }
 0x3b4   : > { %v4694_v24 = vmul.f32 %v3979_v21, %v3977_v16  ;;  %v1674_v16 = vld [vmem:[#allocation8 + $0x160] sm:$0xff]  ;;  %v3479_v21 = vpack.c.bf16 %v1675_v25, %v1671_v14 }
 0x3b5   : > { %v3481_v52 = vpack.c.bf16 %v1674_v16, %v1670_v15  ;;  %v1930_v14 = vld [vmem:[#allocation10 + $0x60] sm:$0xff]  ;;  %v1935_v15 = vld [vmem:[#allocation10 + $0x88] sm:$0xff] }
 0x3b6   : > { %1517 = vmatmul.mubr.f32.vlgmr.msra.gmra.mrb[6].mxu0 %v4694_v24  ;;  %1588 = vmatmul.mubr.f32.vlgmr.msra.gmra.mrb[8].mxu1 %v4694_v24  ;;  %v1939_v16 = vld [vmem:[#allocation10 + $0xa8] sm:$0xff] }
 0x3b7   : > { %3462 = vmatpush1.bf16.msra.mxu0 %v3461_v22  ;;  %3494 = vmatpush1.bf16.msra.mxu1 %v3493_v30  ;;  %v3511_v22 = vpack.c.bf16 %v1677_v27, %v1673_v19  ;;  %v1672_v30 = vld [vmem:[#allocation8 + $0x150] sm:$0xff]  ;;  %v4728_v19 = vpack.c.bf16 %v1930_v14, %v1926_v62 }
 0x3b8   : > { %3464 = vmatprep.subr.bf16.mxu0 %v3463_v38  ;;  %3496 = vmatprep.subr.bf16.mxu1 %v3495_v45  ;;  %v1683_v38 = vld [vmem:[#allocation8 + $0x1a8] sm:$0xff]  ;;  %v1681_v45 = vld [vmem:[#allocation8 + $0x198] sm:$0xff]  ;;  %v3513_v54 = vpack.c.bf16 %v1676_v31, %v1672_v30  ;;  %v1928_v27 = vld [vmem:[#allocation10 + $0x50] sm:$0xff] }
 0x3b9   : > { %1780 = vmatprep.mubr.f32.mxu0 %v4201_v8  ;;  %1869 = vmatprep.mubr.f32.mxu1 %v4201_v8  ;;  %v3483_v5 = vpack.c.bf16 %v1683_v38, %v1679_v36  ;;  %v1941_v30 = vld [vmem:[#allocation10 + $0xb8] sm:$0xff]  ;;  %v1934_v31 = vld [vmem:[#allocation10 + $0x80] sm:$0xff]  ;;  %v1960_v62 = vld [vmem:[#allocation10 + $0x150] sm:$0xff] }
 0x3ba   : > { %v1938_v36 = vld [vmem:[#allocation10 + $0xa0] sm:$0xff] }
 0x3bb   : > { %3466 = vmatpush1.bf16.msra.mxu0 %v3465_v11  ;;  %3498 = vmatpush1.bf16.msra.mxu1 %v3497_v17  ;;  %v3515_v11 = vpack.c.bf16 %v1685_v47, %v1681_v45  ;;  %v1680_v17 = vld [vmem:[#allocation8 + $0x190] sm:$0xff]  ;;  %v4740_v45 = vpack.c.bf16 %v1938_v36, %v1934_v31  ;;  %v1973_v31 = vld [vmem:[#allocation10 + $0x1b8] sm:$0xff]  ;;  %v1966_v36 = vld [vmem:[#allocation10 + $0x180] sm:$0xff] }
 0x3bc   : > { %3468 = vmatprep.subr.bf16.mxu0 %v3467_v42  ;;  %3500 = vmatprep.subr.bf16.mxu1 %v3499_v26  ;;  %v1691_v42 = vld [vmem:[#allocation8 + $0x1e8] sm:$0xff]  ;;  %v1689_v26 = vld [vmem:[#allocation8 + $0x1d8] sm:$0xff]  ;;  %v3517_v3 = vpack.c.bf16 %v1684_v35, %v1680_v17  ;;  %v1936_v47 = vld [vmem:[#allocation10 + $0x90] sm:$0xff] }
 0x3bd   : > { %v3487_v13 = vpack.c.bf16 %v1691_v42, %v1687_v18  ;;  %v3519_v20 = vpack.c.bf16 %v1693_v32, %v1689_v26  ;;  %v1949_v17 = vld [vmem:[#allocation10 + $0xf8] sm:$0xff]  ;;  %v1942_v35 = vld [vmem:[#allocation10 + $0xc0] sm:$0xff]  ;;  %v1944_v32 = vld [vmem:[#allocation10 + $0xd0] sm:$0xff] }
 0x3be   : > { %v1946_v18 = vld [vmem:[#allocation10 + $0xe0] sm:$0xff] }
 0x3bf   : > { %3470 = vmatpush1.bf16.msra.mxu0 %v3469_v23  ;;  %3502 = vmatpush1.bf16.msra.mxu1 %v3501_v28  ;;  %v1690_v23 = vld [vmem:[#allocation8 + $0x1e0] sm:$0xff]  ;;  %v1688_v28 = vld [vmem:[#allocation8 + $0x1d0] sm:$0xff]  ;;  %v4752_v26 = vpack.c.bf16 %v1946_v18, %v1942_v35  ;;  %v1975_v35 = vld [vmem:[#allocation10 + $0x1c8] sm:$0xff] }
 0x3c0   : > { %3472 = vmatprep.subr.bf16.mxu0 %v3471_v39  ;;  %3504 = vmatprep.subr.bf16.mxu1 %v3503_v44  ;;  %v3489_v37 = vpack.c.bf16 %v1690_v23, %v1686_v12  ;;  %v3521_v39 = vpack.c.bf16 %v1692_v29, %v1688_v28  ;;  %v1923_v44 = vld [vmem:[#allocation10 + $0x28] sm:$0xff]  ;;  %v1957_v28 = vld [vmem:[#allocation10 + $0x138] sm:$0xff]  ;;  %v1950_v29 = vld [vmem:[#allocation10 + $0x100] sm:$0xff] }
 0x3c1   : > { %v1951_v12 = vld [vmem:[#allocation10 + $0x108] sm:$0xff] }
 0x3c2   : > { %v1979_v18 = vld [vmem:[#allocation10 + $0x1e8] sm:$0xff] }
 0x3c3   : > { %3474 = vmatpush1.bf16.msra.mxu0 %v3473_v48  ;;  %3506 = vmatpush1.bf16.msra.mxu1 %v3505_v49  ;;  %v1920_v48 = vld [vmem:[#allocation10 + $0x10] sm:$0xff] }
 0x3c4   : > { %3476 = vmatprep.subr.bf16.mxu0 %v3475_v41  ;;  %3508 = vmatprep.subr.bf16.mxu1 %v3507_v33  ;;  %v1924_v49 = vld [vmem:[#allocation10 + $0x30] sm:$0xff]  ;;  %v1929_v41 = vld [vmem:[#allocation10 + $0x58] sm:$0xff]  ;;  %v4724_v33 = vpack.c.bf16 %v1931_v57, %v1927_v51 }
 0x3c5   : > { %v4726_v25 = vpack.c.bf16 %v1933_v50, %v1929_v41  ;;  %v1958_v41 = vld [vmem:[#allocation10 + $0x140] sm:$0xff] }
 0x3c6   : > { %v1962_v50 = vld [vmem:[#allocation10 + $0x160] sm:$0xff] }
 0x3c7   : > { %3478 = vmatpush1.bf16.msra.mxu0 %v3477_v9  ;;  %3510 = vmatpush1.bf16.msra.mxu1 %v3509_v10  ;;  %v1932_v9 = vld [vmem:[#allocation10 + $0x70] sm:$0xff]  ;;  %v4776_v14 = vpack.c.bf16 %v1962_v50, %v1958_v41 }
 0x3c8   : > { %3480 = vmatprep.subr.bf16.mxu0 %v3479_v21  ;;  %3512 = vmatprep.subr.bf16.mxu1 %v3511_v22  ;;  %v4731_v10 = vpack.c.bf16 %v1932_v9, %v1928_v27  ;;  %v1937_v21 = vld [vmem:[#allocation10 + $0x98] sm:$0xff]  ;;  %v4736_v22 = vpack.c.bf16 %v1939_v16, %v1935_v15  ;;  %v1964_v27 = vld [vmem:[#allocation10 + $0x170] sm:$0xff]  ;;  %v1967_v9 = vld [vmem:[#allocation10 + $0x188] sm:$0xff] }
 0x3c9   : > { %v4738_v38 = vpack.c.bf16 %v1941_v30, %v1937_v21  ;;  %v1971_v15 = vld [vmem:[#allocation10 + $0x1a8] sm:$0xff]  ;;  %v4780_v16 = vpack.c.bf16 %v1964_v27, %v1960_v62  ;;  %v1969_v30 = vld [vmem:[#allocation10 + $0x198] sm:$0xff] }
 0x3ca   : > { %v4782_v21 = vpack.c.bf16 %v1971_v15, %v1967_v9 }
 0x3cb   : > { %3482 = vmatpush1.bf16.msra.mxu0 %v3481_v52  ;;  %3514 = vmatpush1.bf16.msra.mxu1 %v3513_v54  ;;  %v1940_v52 = vld [vmem:[#allocation10 + $0xb0] sm:$0xff] }
 0x3cc   : > { %3484 = vmatprep.subr.bf16.mxu0 %v3483_v5  ;;  %3516 = vmatprep.subr.bf16.mxu1 %v3515_v11  ;;  %v4743_v54 = vpack.c.bf16 %v1940_v52, %v1936_v47  ;;  %v1945_v5 = vld [vmem:[#allocation10 + $0xd8] sm:$0xff]  ;;  %v4748_v11 = vpack.c.bf16 %v1947_v60, %v1943_v59  ;;  %v4784_v47 = vpack.c.bf16 %v1973_v31, %v1969_v30  ;;  %v1970_v52 = vld [vmem:[#allocation10 + $0x1a0] sm:$0xff]  ;;  %v1968_v59 = vld [vmem:[#allocation10 + $0x190] sm:$0xff] }
 0x3cd   : > { %v4750_v42 = vpack.c.bf16 %v1949_v17, %v1945_v5  ;;  %v1972_v60 = vld [vmem:[#allocation10 + $0x1b0] sm:$0xff]  ;;  %v4787_v5 = vpack.c.bf16 %v1970_v52, %v1966_v36 }
 0x3ce   : > { %v4791_v17 = vpack.c.bf16 %v1972_v60, %v1968_v59 }
 0x3cf   : > { %3486 = vmatpush1.bf16.msra.mxu0 %v3485_v2  ;;  %3518 = vmatpush1.bf16.msra.mxu1 %v3517_v3  ;;  %v1948_v2 = vld [vmem:[#allocation10 + $0xf0] sm:$0xff] }
 0x3d0   : > { %3488 = vmatprep.subr.bf16.mxu0 %v3487_v13  ;;  %3520 = vmatprep.subr.bf16.mxu1 %v3519_v20  ;;  %v4755_v3 = vpack.c.bf16 %v1948_v2, %v1944_v32  ;;  %v1955_v13 = vld [vmem:[#allocation10 + $0x128] sm:$0xff]  ;;  %v1953_v20 = vld [vmem:[#allocation10 + $0x118] sm:$0xff]  ;;  %v4796_v2 = vpack.c.bf16 %v1979_v18, %v1975_v35 }
 0x3d1   : > { %v4760_v23 = vpack.c.bf16 %v1955_v13, %v1951_v12  ;;  %v1977_v32 = vld [vmem:[#allocation10 + $0x1d8] sm:$0xff]  ;;  %v1974_v13 = vld [vmem:[#allocation10 + $0x1c0] sm:$0xff] }
 0x3d2   : > { %v1981_v12 = vld [vmem:[#allocation10 + $0x1f8] sm:$0xff] }
 0x3d3   : > { %3490 = vmatpush1.bf16.msra.mxu0 %v3489_v37  ;;  %3522 = vmatpush1.bf16.msra.mxu1 %v3521_v39  ;;  %v1954_v37 = vld [vmem:[#allocation10 + $0x120] sm:$0xff]  ;;  %v4762_v39 = vpack.c.bf16 %v1957_v28, %v1953_v20  ;;  %v4798_v28 = vpack.c.bf16 %v1981_v12, %v1977_v32 }
 0x3d4   : > { %3556 = vmatprep.subr.bf16.mxu1 %v4714_v58  ;;  %v1978_v20 = vld [vmem:[#allocation10 + $0x1e0] sm:$0xff] }
 0x3d6   : > { %1781 = vmatmul.mubr.f32.vlgmr.msra.gmra.mrb[16].mxu0 %v4620_v1  ;;  %1870 = vmatmul.mubr.f32.vlgmr.msra.gmra.mrb[10].mxu1 %v4620_v1  ;;  %v1919_v1 = vld [vmem:[#allocation10 + $0x8] sm:$0xff] }
 0x3d7   : > { %1786 = vmatprep.mubr.f32.mxu0 %v4201_v8  ;;  %1875 = vmatprep.mubr.f32.mxu1 %v4201_v8  ;;  %v4712_v53 = vpack.c.bf16 %v1923_v44, %v1919_v1  ;;  %v4764_v1 = vpack.c.bf16 %v1954_v37, %v1950_v29  ;;  %v1952_v44 = vld [vmem:[#allocation10 + $0x110] sm:$0xff]  ;;  %v4800_v29 = vpack.c.bf16 %v1978_v20, %v1974_v13 }
 0x3d8   : > { %v1976_v37 = vld [vmem:[#allocation10 + $0x1d0] sm:$0xff] }
 0x3d9   : > { %3524 = vmatprep.subr.bf16.mxu0 %v4712_v53 }
 0x3da   : > { %1787 = vmatmul.mubr.f32.gmra.mrb[18].mxu0 %v4665_v34  ;;  %1876 = vmatmul.mubr.f32.gmra.mrb[12].mxu1 %v4665_v34  ;;  %v1922_v34 = vld [vmem:[#allocation10 + $0x20] sm:$0xff] }
 0x3db   : > { %1792 = vmatprep.mubr.f32.mxu0 %v4201_v8  ;;  %1881 = vmatprep.mubr.f32.mxu1 %v4201_v8  ;;  %v4716_v43 = vpack.c.bf16 %v1922_v34, %v1918_v40  ;;  %v4767_v40 = vpack.c.bf16 %v1956_v46, %v1952_v44  ;;  %v1963_v34 = vld [vmem:[#allocation10 + $0x168] sm:$0xff]  ;;  %v1980_v44 = vld [vmem:[#allocation10 + $0x1f0] sm:$0xff] }
 0x3dc   : > { %v4771_v51 = vpack.c.bf16 %v1963_v34, %v1959_v55  ;;  %v4803_v46 = vpack.c.bf16 %v1980_v44, %v1976_v37  ;;  %v1911_v37 = vld [vmem:[#allocation4 + $0x8] sm:$0xff] }
 0x3dd   : > { %3526 = vmatpush1.bf16.msra.mxu0 %v4716_v43 }
 0x3de   : > { %1793 = vmatmul.mubr.f32.gmra.mrb[20].mxu0 %v4694_v24  ;;  %1882 = vmatmul.mubr.f32.gmra.mrb[14].mxu1 %v4694_v24  ;;  %v4719_v24 = vpack.c.bf16 %v1924_v49, %v1920_v48  ;;  %v1961_v48 = vld [vmem:[#allocation10 + $0x158] sm:$0xff] }
 0x3df   : > { %1798 = vmatprep.mubr.f32.mxu0 %v4201_v8  ;;  %1887 = vmatprep.mubr.f32.mxu1 %v4201_v8  ;;  %v1965_v49 = vld [vmem:[#allocation10 + $0x178] sm:$0xff] }
 0x3e0   : > { %3558 = vmatpush1.bf16.msra.mxu1 %v4719_v24  ;;  %3528 = vmatprep.subr.bf16.mxu0 %v4724_v33  ;;  %v4773_v57 = vpack.c.bf16 %v1965_v49, %v1961_v48 }
 0x3e1   : > { %3560 = vmatprep.subr.bf16.mxu1 %v4726_v25  ;;  %3530 = vmatpush1.bf16.msra.mxu0 %v4728_v19 }
 0x3e2   : > { %3532 = vmatprep.subr.bf16.mxu0 %v4736_v22 }
 0x3e4   : > { %3562 = vmatpush1.bf16.msra.mxu1 %v4731_v10 }
 0x3e5   : > { %3564 = vmatprep.subr.bf16.mxu1 %v4738_v38  ;;  %3534 = vmatpush1.bf16.msra.mxu0 %v4740_v45 }
 0x3e6   : > { %3536 = vmatprep.subr.bf16.mxu0 %v4748_v11 }
 0x3e8   : > { %3566 = vmatpush1.bf16.msra.mxu1 %v4743_v54 }
 0x3e9   : > { %3568 = vmatprep.subr.bf16.mxu1 %v4750_v42  ;;  %3538 = vmatpush1.bf16.msra.mxu0 %v4752_v26 }
 0x3ea   : > { %3540 = vmatprep.subr.bf16.mxu0 %v4760_v23 }
 0x3ec   : > { %3570 = vmatpush1.bf16.msra.mxu1 %v4755_v3 }
 0x3ed   : > { %3572 = vmatprep.subr.bf16.mxu1 %v4762_v39  ;;  %3542 = vmatpush1.bf16.msra.mxu0 %v4764_v1 }
 0x3ee   : > { %3544 = vmatprep.subr.bf16.mxu0 %v4771_v51 }
 0x3f0   : > { %3574 = vmatpush1.bf16.msra.mxu1 %v4767_v40 }
 0x3f1   : > { %3576 = vmatprep.subr.bf16.mxu1 %v4773_v57  ;;  %3546 = vmatpush1.bf16.msra.mxu0 %v4776_v14 }
 0x3f2   : > { %3548 = vmatprep.subr.bf16.mxu0 %v4782_v21 }
 0x3f4   : > { %3578 = vmatpush1.bf16.msra.mxu1 %v4780_v16 }
 0x3f5   : > { %3580 = vmatprep.subr.bf16.mxu1 %v4784_v47  ;;  %3550 = vmatpush1.bf16.msra.mxu0 %v4787_v5 }
 0x3f6   : > { %3552 = vmatprep.subr.bf16.mxu0 %v4796_v2 }
 0x3f8   : > { %3582 = vmatpush1.bf16.msra.mxu1 %v4791_v17 }
 0x3f9   : > { %3584 = vmatprep.subr.bf16.mxu1 %v4798_v28  ;;  %3554 = vmatpush1.bf16.msra.mxu0 %v4800_v29 }
 0x3fa   : > { %3588 = vmatprep.subr.bf16.mxu0 %v4712_v53 }
 0x3fc   : > { %3586 = vmatpush1.bf16.msra.mxu1 %v4803_v46 }
 0x3fd   : > { %3620 = vmatprep.subr.bf16.mxu1 %v4714_v58 }
 0x489   : > { %v1518_v55 = vpop.f32.mrb[6].mxu0  ;;  %v1589_v34 = vpop.f32.mrb[8].mxu1 }
 0x48a   : > { %v3819_v48 = vadd.f32 %v1518_v55, %v4591_v6  ;;  %v1596_v49 = vadd.f32 %v1589_v34, %v4613_v56  ;;  %v1520_v41 = vpop.f32.mrb[7].mxu0  ;;  %v1591_v50 = vpop.f32.mrb[9].mxu1  ;;  %v5010_v55 = vsub.s32 1, %v4582_v63 }
 0x48b   : > { %v3820_v62 = vadd.f32 %v1520_v41, %v4595_v7  ;;  %v1597_v27 = vadd.f32 %v1591_v50, %v4615_v4 }
 0x48c   : > { %v3127_v9 = vmul.f32 -1.442695, %v3819_v48  ;;  %v3129_v30 = vmul.f32 -1.442695, %v1596_v49 }
 0x48d   : > { %v3128_v15 = vmul.f32 -1.442695, %v3820_v62 }
 0x48e   : > { %3980 = vpow2.f32 %v3127_v9 }
 0x48f   : > { %3982 = vpow2.f32 %v3128_v15 }
 0x490   : > { %3984 = vtanh.f32 %v1597_v27 }
 0x491   : > { %3986 = vpow2.f32 %v3129_v30  ;;  %v5011_v30 = vsub.s32 2, %v4582_v63 }
 0x498   : > { %v3981_v31 = vpop.eup %3980 }
 0x499   : > { %v1607_v36 = vadd.f32 1.0, %v3981_v31  ;;  %v3983_v52 = vpop.eup %3982 }
 0x49a   : > { %v1608_v6 = vadd.f32 1.0, %v3983_v52  ;;  %v3985_v56 = vpop.eup %3984 }
 0x49b   : > { %3988 = vrcp.f32 %v1607_v36  ;;  %v3987_v59 = vpop.eup %3986 }
 0x49c   : > { %3990 = vrcp.f32 %v1608_v6  ;;  %v1609_v18 = vadd.f32 1.0, %v3987_v59 }
 0x49e   : > { %3992 = vrcp.f32 %v1609_v18 }
 0x4a5   : > { %v3989_v60 = vpop.eup %3988 }
 0x4a6   : > { %v1618_v35 = vmul.f32 %v3989_v60, %v3985_v56  ;;  %v3991_v7 = vpop.eup %3990 }
 0x4a7   : > { %v1617_v4 = vmul.f32 %v3991_v7, %v4691_v61  ;;  %v1694_v61 = vld [vmem:[%s4990_s6] sm:$0xf] }
 0x4a8   : > { %v3993_v12 = vpop.eup %3992  ;;  %v4856_v44 = vrot.slane %v1694_v61, %v413_v0  ;;  %v4860_v34 = vrot.slane %v1694_v61, %v5010_v55  ;;  %v4866_v31 = vrot.slane %v1694_v61, %v5011_v30  ;;  %v5012_v0 = vsub.s32 3, %v4582_v63 }
 0x4a9   : > { %v1619_v32 = vadd.f32 %v1618_v35, %v1617_v4 }
 0x4aa   : > { %v4870_v36 = vrot.slane %v1694_v61, %v5012_v0 }
 0x4ab   : > { %1625 = vst [vmem:[#allocation5] sm:$0xff] %v1619_v32  ;;  %3994 = vtanh.f32 %v1619_v32 }
 0x4b5   : > { %v3995_v13 = vpop.eup %3994 }
 0x4b6   : > { %v1621_v20 = vmul.f32 %v3995_v13, %v3993_v12  ;;  %v1913_v12 = vld [vmem:[#allocation5 + $0x8] sm:$0xff] }
 0x4b8   : > { %1624 = vst [vmem:[#allocation4] sm:$0xff] %v1621_v20  ;;  %1799 = vmatmul.mubr.f32.gmra.mrb[22].mxu0 %v1621_v20  ;;  %1888 = vmatmul.mubr.f32.gmra.mrb[16].mxu1 %v1621_v20 }
 0x4b9   : > { %2046 = vmatprep.mubr.f32.mxu0 %v4201_v8  ;;  %2117 = vmatprep.mubr.f32.mxu1 %v4201_v8 }
 0x4bc   : > { %2047 = vmatmul.mubr.f32.vlgmr.msra.gmra.mrb[16].mxu0 %v1911_v37  ;;  %2118 = vmatmul.mubr.f32.vlgmr.msra.gmra.mrb[10].mxu1 %v1911_v37 }
 0x4bd   : > { %3590 = vmatpush1.bf16.msra.mxu0 %v4716_v43  ;;  %3622 = vmatpush1.bf16.msra.mxu1 %v4719_v24 }
 0x4be   : > { %3592 = vmatprep.subr.bf16.mxu0 %v4724_v33  ;;  %3624 = vmatprep.subr.bf16.mxu1 %v4726_v25 }
 0x4bf   : > { %2285 = vmatprep.mubr.f32.mxu0 %v4201_v8  ;;  %2356 = vmatprep.mubr.f32.mxu1 %v4201_v8 }
 0x4c1   : > { %3594 = vmatpush1.bf16.msra.mxu0 %v4728_v19  ;;  %3626 = vmatpush1.bf16.msra.mxu1 %v4731_v10 }
 0x4c2   : > { %3596 = vmatprep.subr.bf16.mxu0 %v4736_v22  ;;  %3628 = vmatprep.subr.bf16.mxu1 %v4738_v38 }
 0x4c5   : > { %3598 = vmatpush1.bf16.msra.mxu0 %v4740_v45  ;;  %3630 = vmatpush1.bf16.msra.mxu1 %v4743_v54 }
 0x4c6   : > { %3600 = vmatprep.subr.bf16.mxu0 %v4748_v11  ;;  %3632 = vmatprep.subr.bf16.mxu1 %v4750_v42 }
 0x4c9   : > { %3602 = vmatpush1.bf16.msra.mxu0 %v4752_v26  ;;  %3634 = vmatpush1.bf16.msra.mxu1 %v4755_v3 }
 0x4ca   : > { %3604 = vmatprep.subr.bf16.mxu0 %v4760_v23  ;;  %3636 = vmatprep.subr.bf16.mxu1 %v4762_v39 }
 0x4cd   : > { %3606 = vmatpush1.bf16.msra.mxu0 %v4764_v1  ;;  %3638 = vmatpush1.bf16.msra.mxu1 %v4767_v40 }
 0x4ce   : > { %3608 = vmatprep.subr.bf16.mxu0 %v4771_v51  ;;  %3640 = vmatprep.subr.bf16.mxu1 %v4773_v57 }
 0x4d1   : > { %3610 = vmatpush1.bf16.msra.mxu0 %v4776_v14  ;;  %3642 = vmatpush1.bf16.msra.mxu1 %v4780_v16 }
 0x4d2   : > { %3612 = vmatprep.subr.bf16.mxu0 %v4782_v21  ;;  %3644 = vmatprep.subr.bf16.mxu1 %v4784_v47 }
 0x4d5   : > { %3614 = vmatpush1.bf16.msra.mxu0 %v4787_v5  ;;  %3646 = vmatpush1.bf16.msra.mxu1 %v4791_v17 }
 0x4d6   : > { %3616 = vmatprep.subr.bf16.mxu0 %v4796_v2  ;;  %3648 = vmatprep.subr.bf16.mxu1 %v4798_v28 }
 0x4d9   : > { %3618 = vmatpush1.bf16.msra.mxu0 %v4800_v29  ;;  %3650 = vmatpush1.bf16.msra.mxu1 %v4803_v46 }
 0x4da   : > { %3652 = vmatprep.subr.bf16.mxu0 %v4712_v53  ;;  %3684 = vmatprep.subr.bf16.mxu1 %v4714_v58 }
 0x58f   : > { %v2048_v48 = vpop.f32.mrb[16].mxu0  ;;  %v2119_v49 = vpop.f32.mrb[10].mxu1 }
 0x590   : > { %v3837_v41 = vadd.f32 %v2048_v48, %v4856_v44  ;;  %v2050_v50 = vpop.f32.mrb[17].mxu0  ;;  %v2121_v62 = vpop.f32.mrb[11].mxu1  ;;  %v3845_v52 = vadd.f32 %v2119_v49, %v4866_v31 }
 0x591   : > { %v3838_v27 = vadd.f32 %v2050_v50, %v4860_v34  ;;  %v3846_v6 = vadd.f32 %v2121_v62, %v4870_v36 }
 0x592   : > { %v3130_v9 = vmul.f32 -1.442695, %v3837_v41  ;;  %v3132_v56 = vmul.f32 -1.442695, %v3845_v52 }
 0x593   : > { %v3131_v15 = vmul.f32 -1.442695, %v3838_v27 }
 0x594   : > { %3996 = vpow2.f32 %v3130_v9 }
 0x595   : > { %3998 = vpow2.f32 %v3131_v15 }
 0x596   : > { %4000 = vtanh.f32 %v3846_v6 }
 0x597   : > { %4002 = vpow2.f32 %v3132_v56 }
 0x59e   : > { %v3997_v59 = vpop.eup %3996 }
 0x59f   : > { %v2137_v60 = vadd.f32 1.0, %v3997_v59  ;;  %v3999_v35 = vpop.eup %3998 }
 0x5a0   : > { %v2138_v7 = vadd.f32 1.0, %v3999_v35  ;;  %v4001_v18 = vpop.eup %4000 }
 0x5a1   : > { %4004 = vrcp.f32 %v2137_v60  ;;  %v4003_v4 = vpop.eup %4002 }
 0x5a2   : > { %4006 = vrcp.f32 %v2138_v7  ;;  %v2139_v20 = vadd.f32 1.0, %v4003_v4 }
 0x5a4   : > { %4008 = vrcp.f32 %v2139_v20 }
 0x5ab   : > { %v4005_v32 = vpop.eup %4004 }
 0x5ac   : > { %v2148_v63 = vmul.f32 %v4005_v32, %v4001_v18  ;;  %v4007_v13 = vpop.eup %4006 }
 0x5ad   : > { %v2147_v37 = vmul.f32 %v4007_v13, %v1913_v12 }
 0x5ae   : > { %v4009_v55 = vpop.eup %4008 }
 0x5af   : > { %v4874_v61 = vadd.f32 %v2148_v63, %v2147_v37 }
 0x5b1   : > { %4010 = vtanh.f32 %v4874_v61 }
 0x5bb   : > { %v4011_v48 = vpop.eup %4010 }
 0x5bc   : > { %v4877_v49 = vmul.f32 %v4011_v48, %v4009_v55  ;;  %v2880_v48 = vld [vmem:[#allocation11 + $0x20] sm:$0xff] }
 0x5be   : > { %2286 = vmatmul.mubr.f32.vlgmr.msra.gmra.mrb[18].mxu0 %v4877_v49  ;;  %2357 = vmatmul.mubr.f32.vlgmr.msra.gmra.mrb[12].mxu1 %v4877_v49 }
 0x5bf   : > { %3654 = vmatpush1.bf16.msra.mxu0 %v4716_v43  ;;  %3686 = vmatpush1.bf16.msra.mxu1 %v4719_v24 }
 0x5c0   : > { %3656 = vmatprep.subr.bf16.mxu0 %v4724_v33  ;;  %3688 = vmatprep.subr.bf16.mxu1 %v4726_v25 }
 0x5c1   : > { %2524 = vmatprep.mubr.f32.mxu0 %v4201_v8  ;;  %2595 = vmatprep.mubr.f32.mxu1 %v4201_v8 }
 0x5c3   : > { %3658 = vmatpush1.bf16.msra.mxu0 %v4728_v19  ;;  %3690 = vmatpush1.bf16.msra.mxu1 %v4731_v10 }
 0x5c4   : > { %3660 = vmatprep.subr.bf16.mxu0 %v4736_v22  ;;  %3692 = vmatprep.subr.bf16.mxu1 %v4738_v38 }
 0x5c7   : > { %3662 = vmatpush1.bf16.msra.mxu0 %v4740_v45  ;;  %3694 = vmatpush1.bf16.msra.mxu1 %v4743_v54 }
 0x5c8   : > { %3664 = vmatprep.subr.bf16.mxu0 %v4748_v11  ;;  %3696 = vmatprep.subr.bf16.mxu1 %v4750_v42 }
 0x5cb   : > { %3666 = vmatpush1.bf16.msra.mxu0 %v4752_v26  ;;  %3698 = vmatpush1.bf16.msra.mxu1 %v4755_v3 }
 0x5cc   : > { %3668 = vmatprep.subr.bf16.mxu0 %v4760_v23  ;;  %3700 = vmatprep.subr.bf16.mxu1 %v4762_v39 }
 0x5cf   : > { %3670 = vmatpush1.bf16.msra.mxu0 %v4764_v1  ;;  %3702 = vmatpush1.bf16.msra.mxu1 %v4767_v40 }
 0x5d0   : > { %3672 = vmatprep.subr.bf16.mxu0 %v4771_v51  ;;  %3704 = vmatprep.subr.bf16.mxu1 %v4773_v57 }
 0x5d3   : > { %3674 = vmatpush1.bf16.msra.mxu0 %v4776_v14  ;;  %3706 = vmatpush1.bf16.msra.mxu1 %v4780_v16 }
 0x5d4   : > { %3676 = vmatprep.subr.bf16.mxu0 %v4782_v21  ;;  %3708 = vmatprep.subr.bf16.mxu1 %v4784_v47 }
 0x5d7   : > { %3678 = vmatpush1.bf16.msra.mxu0 %v4787_v5  ;;  %3710 = vmatpush1.bf16.msra.mxu1 %v4791_v17 }
 0x5d8   : > { %3680 = vmatprep.subr.bf16.mxu0 %v4796_v2  ;;  %3712 = vmatprep.subr.bf16.mxu1 %v4798_v28 }
 0x5db   : > { %3682 = vmatpush1.bf16.msra.mxu0 %v4800_v29  ;;  %3714 = vmatpush1.bf16.msra.mxu1 %v4803_v46 }
 0x5dc   : > { %3716 = vmatprep.subr.bf16.mxu0 %v4712_v53  ;;  %3748 = vmatprep.subr.bf16.mxu1 %v4714_v58 }
 0x691   : > { %v2287_v41 = vpop.f32.mrb[18].mxu0  ;;  %v2358_v50 = vpop.f32.mrb[12].mxu1 }
 0x692   : > { %v3839_v62 = vadd.f32 %v2287_v41, %v4856_v44  ;;  %v2289_v27 = vpop.f32.mrb[19].mxu0  ;;  %v2360_v9 = vpop.f32.mrb[13].mxu1  ;;  %v3847_v52 = vadd.f32 %v2358_v50, %v4866_v31  ;;  %v2881_v41 = vld [vmem:[#allocation11 + $0x28] sm:$0xff] }
 0x693   : > { %v3840_v15 = vadd.f32 %v2289_v27, %v4860_v34  ;;  %v3848_v6 = vadd.f32 %v2360_v9, %v4870_v36  ;;  %v3787_v50 = vpack.c.bf16 %v2881_v41, %v2880_v48  ;;  %v2883_v27 = vld [vmem:[#allocation11 + $0x38] sm:$0xff] }
 0x694   : > { %v3133_v30 = vmul.f32 -1.442695, %v3839_v62  ;;  %v3135_v56 = vmul.f32 -1.442695, %v3847_v52  ;;  %v2882_v62 = vld [vmem:[#allocation11 + $0x30] sm:$0xff] }
 0x695   : > { %v3134_v0 = vmul.f32 -1.442695, %v3840_v15  ;;  %v3791_v9 = vpack.c.bf16 %v2883_v27, %v2882_v62  ;;  %v2884_v15 = vld [vmem:[#allocation11 + $0x40] sm:$0xff]  ;;  %v2886_v52 = vld [vmem:[#allocation11 + $0x50] sm:$0xff] }
 0x696   : > { %4012 = vpow2.f32 %v3133_v30  ;;  %v2885_v30 = vld [vmem:[#allocation11 + $0x48] sm:$0xff] }
 0x697   : > { %4014 = vpow2.f32 %v3134_v0  ;;  %v3795_v0 = vpack.c.bf16 %v2885_v30, %v2884_v15 }
 0x698   : > { %4016 = vtanh.f32 %v3848_v6  ;;  %v2887_v6 = vld [vmem:[#allocation11 + $0x58] sm:$0xff] }
 0x699   : > { %4018 = vpow2.f32 %v3135_v56  ;;  %v3799_v56 = vpack.c.bf16 %v2887_v6, %v2886_v52 }
 0x6a0   : > { %v4013_v53 = vpop.eup %4012 }
 0x6a1   : > { %v2376_v59 = vadd.f32 1.0, %v4013_v53  ;;  %v4015_v58 = vpop.eup %4014  ;;  %v2888_v53 = vld [vmem:[#allocation11 + $0x60] sm:$0xff] }
 0x6a2   : > { %v2377_v60 = vadd.f32 1.0, %v4015_v58  ;;  %v4017_v35 = vpop.eup %4016  ;;  %v2890_v58 = vld [vmem:[#allocation11 + $0x70] sm:$0xff] }
 0x6a3   : > { %4020 = vrcp.f32 %v2376_v59  ;;  %v4019_v7 = vpop.eup %4018  ;;  %v2889_v59 = vld [vmem:[#allocation11 + $0x68] sm:$0xff] }
 0x6a4   : > { %4022 = vrcp.f32 %v2377_v60  ;;  %v2378_v12 = vadd.f32 1.0, %v4019_v7  ;;  %v2891_v60 = vld [vmem:[#allocation11 + $0x78] sm:$0xff] }
 0x6a6   : > { %4024 = vrcp.f32 %v2378_v12 }
 0x6ad   : > { %v4021_v18 = vpop.eup %4020 }
 0x6ae   : > { %v2387_v4 = vmul.f32 %v4021_v18, %v4017_v35  ;;  %v4023_v32 = vpop.eup %4022  ;;  %v3807_v35 = vpack.c.bf16 %v2891_v60, %v2890_v58 }
 0x6af   : > { %v2386_v63 = vmul.f32 %v4023_v32, %v4874_v61 }
 0x6b0   : > { %v4025_v20 = vpop.eup %4024 }
 0x6b1   : > { %v4920_v13 = vadd.f32 %v2387_v4, %v2386_v63 }
 0x6b3   : > { %4026 = vtanh.f32 %v4920_v13 }
 0x6bd   : > { %v4027_v37 = vpop.eup %4026 }
 0x6be   : > { %v4923_v55 = vmul.f32 %v4027_v37, %v4025_v20 }
 0x6c0   : > { %2525 = vmatmul.mubr.f32.vlgmr.msra.gmra.mrb[20].mxu0 %v4923_v55  ;;  %2596 = vmatmul.mubr.f32.vlgmr.msra.gmra.mrb[14].mxu1 %v4923_v55 }
 0x6c1   : > { %3718 = vmatpush1.bf16.msra.mxu0 %v4716_v43  ;;  %3750 = vmatpush1.bf16.msra.mxu1 %v4719_v24  ;;  %v2877_v43 = vld [vmem:[#allocation11 + $0x8] sm:$0xff] }
 0x6c2   : > { %3720 = vmatprep.subr.bf16.mxu0 %v4724_v33  ;;  %3752 = vmatprep.subr.bf16.mxu1 %v4726_v25 }
 0x6c3   : > { %2763 = vmatprep.mubr.f32.mxu0 %v4201_v8  ;;  %2834 = vmatprep.mubr.f32.mxu1 %v4201_v8  ;;  %v2876_v8 = vld [vmem:[#allocation11] sm:$0xff] }
 0x6c4   : > { %v3779_v24 = vpack.c.bf16 %v2877_v43, %v2876_v8 }
 0x6c5   : > { %3722 = vmatpush1.bf16.msra.mxu0 %v4728_v19  ;;  %3754 = vmatpush1.bf16.msra.mxu1 %v4731_v10 }
 0x6c6   : > { %3724 = vmatprep.subr.bf16.mxu0 %v4736_v22  ;;  %3756 = vmatprep.subr.bf16.mxu1 %v4738_v38 }
 0x6c9   : > { %3726 = vmatpush1.bf16.msra.mxu0 %v4740_v45  ;;  %3758 = vmatpush1.bf16.msra.mxu1 %v4743_v54 }
 0x6ca   : > { %3728 = vmatprep.subr.bf16.mxu0 %v4748_v11  ;;  %3760 = vmatprep.subr.bf16.mxu1 %v4750_v42 }
 0x6cd   : > { %3730 = vmatpush1.bf16.msra.mxu0 %v4752_v26  ;;  %3762 = vmatpush1.bf16.msra.mxu1 %v4755_v3 }
 0x6ce   : > { %3732 = vmatprep.subr.bf16.mxu0 %v4760_v23  ;;  %3764 = vmatprep.subr.bf16.mxu1 %v4762_v39 }
 0x6d1   : > { %3734 = vmatpush1.bf16.msra.mxu0 %v4764_v1  ;;  %3766 = vmatpush1.bf16.msra.mxu1 %v4767_v40 }
 0x6d2   : > { %3736 = vmatprep.subr.bf16.mxu0 %v4771_v51  ;;  %3768 = vmatprep.subr.bf16.mxu1 %v4773_v57 }
 0x6d5   : > { %3738 = vmatpush1.bf16.msra.mxu0 %v4776_v14  ;;  %3770 = vmatpush1.bf16.msra.mxu1 %v4780_v16 }
 0x6d6   : > { %3740 = vmatprep.subr.bf16.mxu0 %v4782_v21  ;;  %3772 = vmatprep.subr.bf16.mxu1 %v4784_v47 }
 0x6d9   : > { %3742 = vmatpush1.bf16.msra.mxu0 %v4787_v5  ;;  %3774 = vmatpush1.bf16.msra.mxu1 %v4791_v17  ;;  %v2878_v17 = vld [vmem:[#allocation11 + $0x10] sm:$0xff] }
 0x6da   : > { %3744 = vmatprep.subr.bf16.mxu0 %v4796_v2  ;;  %3776 = vmatprep.subr.bf16.mxu1 %v4798_v28  ;;  %v2879_v2 = vld [vmem:[#allocation11 + $0x18] sm:$0xff] }
 0x6db   : > { %v3783_v61 = vpack.c.bf16 %v2879_v2, %v2878_v17 }
 0x6dd   : > { %3746 = vmatpush1.bf16.msra.mxu0 %v4800_v29  ;;  %3778 = vmatpush1.bf16.msra.mxu1 %v4803_v46 }
 0x6de   : > { %3780 = vmatprep.subr.bf16.mxu0 %v3779_v24 }
 0x793   : > { %v2526_v33 = vpop.f32.mrb[20].mxu0  ;;  %v2597_v25 = vpop.f32.mrb[14].mxu1 }
 0x794   : > { %v3841_v19 = vadd.f32 %v2526_v33, %v4856_v44  ;;  %v2528_v10 = vpop.f32.mrb[21].mxu0  ;;  %v2599_v22 = vpop.f32.mrb[15].mxu1  ;;  %v3849_v11 = vadd.f32 %v2597_v25, %v4866_v31 }
 0x795   : > { %v3842_v38 = vadd.f32 %v2528_v10, %v4860_v34  ;;  %v3850_v42 = vadd.f32 %v2599_v22, %v4870_v36 }
 0x796   : > { %v3136_v45 = vmul.f32 -1.442695, %v3841_v19  ;;  %v3138_v26 = vmul.f32 -1.442695, %v3849_v11 }
 0x797   : > { %v3137_v54 = vmul.f32 -1.442695, %v3842_v38 }
 0x798   : > { %4028 = vpow2.f32 %v3136_v45 }
 0x799   : > { %4030 = vpow2.f32 %v3137_v54 }
 0x79a   : > { %4032 = vtanh.f32 %v3850_v42 }
 0x79b   : > { %4034 = vpow2.f32 %v3138_v26 }
 0x7a2   : > { %v4029_v3 = vpop.eup %4028 }
 0x7a3   : > { %v2615_v23 = vadd.f32 1.0, %v4029_v3  ;;  %v4031_v39 = vpop.eup %4030 }
 0x7a4   : > { %v2616_v1 = vadd.f32 1.0, %v4031_v39  ;;  %v4033_v40 = vpop.eup %4032 }
 0x7a5   : > { %4036 = vrcp.f32 %v2615_v23  ;;  %v4035_v51 = vpop.eup %4034 }
 0x7a6   : > { %4038 = vrcp.f32 %v2616_v1  ;;  %v2617_v21 = vadd.f32 1.0, %v4035_v51 }
 0x7a8   : > { %4040 = vrcp.f32 %v2617_v21 }
 0x7af   : > { %v4037_v57 = vpop.eup %4036 }
 0x7b0   : > { %v2626_v14 = vmul.f32 %v4037_v57, %v4033_v40  ;;  %v4039_v16 = vpop.eup %4038 }
 0x7b1   : > { %v2625_v47 = vmul.f32 %v4039_v16, %v4920_v13 }
 0x7b2   : > { %v4041_v28 = vpop.eup %4040 }
 0x7b3   : > { %v4964_v5 = vadd.f32 %v2626_v14, %v2625_v47 }
 0x7b5   : > { %4042 = vtanh.f32 %v4964_v5 }
 0x7bf   : > { %v4043_v29 = vpop.eup %4042 }
 0x7c0   : > { %v2629_v46 = vmul.f32 %v4043_v29, %v4041_v28 }
 0x7c2   : > { %2764 = vmatmul.mubr.f32.vlgmr.msra.gmra.mrb[22].mxu0 %v2629_v46  ;;  %2835 = vmatmul.mubr.f32.vlgmr.msra.gmra.mrb[16].mxu1 %v2629_v46 }
 0x7c3   : > { %3782 = vmatpush3.bf16.msra.mxu0 %v3779_v24  ;;  %3197 = vmatprep.mubr.f32.mxu0 %v4877_v49  ;;  %v3803_v49 = vpack.c.bf16 %v2889_v59, %v2888_v53 }
 0x7c4   : > { %3784 = vmatprep.subr.bf16.mxu0 %v3783_v61 }
 0x7c7   : > { %3786 = vmatpush3.bf16.msra.mxu0 %v3783_v61 }
 0x7c8   : > { %3788 = vmatprep.subr.bf16.mxu0 %v3787_v50 }
 0x7cb   : > { %3790 = vmatpush3.bf16.msra.mxu0 %v3787_v50 }
 0x7cc   : > { %3792 = vmatprep.subr.bf16.mxu0 %v3791_v9 }
 0x7cf   : > { %3794 = vmatpush3.bf16.msra.mxu0 %v3791_v9 }
 0x7d0   : > { %3796 = vmatprep.subr.bf16.mxu0 %v3795_v0 }
 0x7d3   : > { %3798 = vmatpush3.bf16.msra.mxu0 %v3795_v0 }
 0x7d4   : > { %3800 = vmatprep.subr.bf16.mxu0 %v3799_v56 }
 0x7d7   : > { %3802 = vmatpush3.bf16.msra.mxu0 %v3799_v56 }
 0x7d8   : > { %3804 = vmatprep.subr.bf16.mxu0 %v3803_v49 }
 0x7db   : > { %3806 = vmatpush3.bf16.msra.mxu0 %v3803_v49 }
 0x7dc   : > { %3808 = vmatprep.subr.bf16.mxu0 %v3807_v35 }
 0x7df   : > { %3810 = vmatpush3.bf16.msra.mxu0 %v3807_v35 }
 0x7e2   : > { %3198 = vmatmul.mubr.f32.vlgmr.msra.gmra.mrb[24].mxu0 %v4923_v55 }
 0x7e3   : > { %3200 = vmatprep.mubr.f32.mxu0 %v2629_v46 }
 0x895   : > { %v2765_v7 = vpop.f32.mrb[22].mxu0  ;;  %v2836_v18 = vpop.f32.mrb[16].mxu1 }
 0x896   : > { %v3843_v4 = vadd.f32 %v2765_v7, %v4856_v44  ;;  %v2767_v32 = vpop.f32.mrb[23].mxu0  ;;  %v2838_v12 = vpop.f32.mrb[17].mxu1  ;;  %v3851_v37 = vadd.f32 %v2836_v18, %v4866_v31 }
 0x897   : > { %v3844_v63 = vadd.f32 %v2767_v32, %v4860_v34  ;;  %v3852_v8 = vadd.f32 %v2838_v12, %v4870_v36  ;;  %v3142_v36 = vld [vmem:[%s4992_s8] ss:$0 sm:$0xff] }
 0x898   : > { %v3139_v13 = vmul.f32 -1.442695, %v3843_v4  ;;  %v3141_v43 = vmul.f32 -1.442695, %v3851_v37 }
 0x899   : > { %v3140_v20 = vmul.f32 -1.442695, %v3844_v63 }
 0x89a   : > { %4044 = vpow2.f32 %v3139_v13 }
 0x89b   : > { %4046 = vpow2.f32 %v3140_v20 }
 0x89c   : > { %4048 = vtanh.f32 %v3852_v8 }
 0x89d   : > { %4050 = vpow2.f32 %v3141_v43 }
 0x8a4   : > { %v4045_v24 = vpop.eup %4044 }
 0x8a5   : > { %v2854_v55 = vadd.f32 1.0, %v4045_v24  ;;  %v4047_v33 = vpop.eup %4046 }
 0x8a6   : > { %v2855_v44 = vadd.f32 1.0, %v4047_v33  ;;  %v4049_v25 = vpop.eup %4048 }
 0x8a7   : > { %4052 = vrcp.f32 %v2854_v55  ;;  %v4051_v34 = vpop.eup %4050 }
 0x8a8   : > { %4054 = vrcp.f32 %v2855_v44  ;;  %v2856_v38 = vadd.f32 1.0, %v4051_v34 }
 0x8aa   : > { %4056 = vrcp.f32 %v2856_v38 }
 0x8b1   : > { %v4053_v19 = vpop.eup %4052 }
 0x8b2   : > { %v2865_v10 = vmul.f32 %v4053_v19, %v4049_v25  ;;  %v4055_v22 = vpop.eup %4054 }
 0x8b3   : > { %v2864_v31 = vmul.f32 %v4055_v22, %v4964_v5 }
 0x8b4   : > { %v4057_v3 = vpop.eup %4056 }
 0x8b5   : > { %v3199_v45 = vpop.f32.mrb[24].mxu0  ;;  %v2866_v54 = vadd.f32 %v2865_v10, %v2864_v31 }
 0x8b6   : > { %v2965_v11 = vpop.f32.mrb[25].mxu0  ;;  %v2971_v26 = vadd.f32 %v3199_v45, %v3142_v36 }
 0x8b7   : > { %v2966_v42 = vadd.f32 %v3142_v36, %v2965_v11  ;;  %2871 = vst [vmem:[#allocation5 + $0x8] sm:$0xff] %v2866_v54  ;;  %4058 = vtanh.f32 %v2866_v54 }
 0x8b8   : > { %2985 = vst [vmem:[%s4410_s29 + $0x8] sm:$0xff] %v2971_v26 }
 0x8b9   : > { %2984 = vst [vmem:[%s4410_s29] sm:$0xff] %v2966_v42 }
 0x8c1   : > { %v4059_v23 = vpop.eup %4058 }
 0x8c2   : > { %v2868_v39 = vmul.f32 %v4059_v23, %v4057_v3 }
 0x8c4   : > { %2870 = vst [vmem:[#allocation4 + $0x8] sm:$0xff] %v2868_v39  ;;  %3201 = vmatmul.mubr.f32.gmra.mrb[26].mxu0 %v2868_v39 }
 0x997   : > { %v3202_v1 = vpop.f32.mrb[26].mxu0 }
 0x998   : > { %v2975_v40 = vpop.f32.mrb[27].mxu0  ;;  %v2981_v57 = vadd.f32 %v3202_v1, %v3142_v36 }
 0x999   : > { %v2976_v51 = vadd.f32 %v3142_v36, %v2975_v40 }
 0x99a   : > { %2987 = vst [vmem:[%s4410_s29 + $0x18] sm:$0xff] %v2981_v57 }
 0x99b   : > { %2986 = vst [vmem:[%s4410_s29 + $0x10] sm:$0xff] %v2976_v51 }
 0x99c PF: > { %s22_s30 = sadd.s32 1, %s4190_s30  }
 0x99d   : > { %p19_p9 = scmp.ge.s32.totalorder %s22_s30, 4  }
 0x99f   :  { %21 = sbr.rel (!%p19_p9) target bundleno = 3 (0x3), region = 116 }
 0x9a6   :  { %3010 = vsyncpa [#allocation7], 1 }
 0x9a7   :  { %3012 = vsyncpa [#allocation7 + $0x1], 1 }
 0x9a8   :  { %3013 = vsyncpa [#allocation9], 1 }
 0x9a9   :  { %3014 = vsyncpa [#allocation12], 1 }

</bundles_post_ra>
